<compile_context>
chip_gen: v6e
topology: v6e:2x2x1
jax: 0.10.0
libtpu: 0.0.40
codegen_flags: <defaults>
</compile_context>

<pallas_src>
import jax
import jax.numpy as jnp
from jax.experimental import pallas as pl
from jax.experimental.pallas import tpu as pltpu

# ---------------- problem sizes (small, consistent with the module) ----------------
B = 2          # batch
C = 4          # image channels
H = W = 16     # spatial
Z_DIM = 32     # generator.z_dim
G_HID = 64     # generator hidden width
F_OUT = 8      # discriminator conv output channels
KH = KW = 3
STRIDE = 2
PAD = 1
OH = (H + 2 * PAD - KH) // STRIDE + 1    # 8
OW = (W + 2 * PAD - KW) // STRIDE + 1    # 8
OHW = OH * OW                            # 64
IMG_FLAT = C * H * W                     # 1024
CONV_FLAT = F_OUT * OHW                  # 512, columns ordered (f, oh, ow) == torch flatten

RPAD = 8                                 # sublane-aligned row offset for the fake block
STACK_ROWS = 2 * RPAD                    # real rows [0, B), fake rows [RPAD, RPAD + B)

_VMEM = pl.BlockSpec(memory_space=pltpu.MemorySpace.VMEM)


def _softplus(z):
    # stable softplus: BCEWithLogits(x, 1) = softplus(-x); BCEWithLogits(x, 0) = softplus(x)
    return jnp.maximum(z, 0.0) + jnp.log1p(jnp.exp(-jnp.abs(z)))


# ---------------- the single fused Pallas kernel ----------------
def gan_kernel(x_ref, noise_ref, gw1_ref, gb1_ref, gw2_ref, gb2_ref,
               wconv_ref, bconv_ref, wd_ref, bd_ref,
               fake_ref, losses_ref, imgs_scr):
    # ---- generator MLP: (B,Z) @ (Z,64) -> ReLU -> (B,64) @ (64, C*H*W) -> Tanh ----
    h = jnp.dot(noise_ref[...], gw1_ref[...], preferred_element_type=jnp.float32) + gb1_ref[...]
    h = jnp.maximum(h, 0.0)
    fake = jnp.tanh(jnp.dot(h, gw2_ref[...], preferred_element_type=jnp.float32) + gb2_ref[...])
    fake_ref[...] = fake                                         # (B, 1024), lane-dense output

    # ---- stack real + fake on sublane-aligned rows; run the discriminator ONCE ----
    imgs_scr[...] = jnp.zeros_like(imgs_scr)
    imgs_scr[0:B, :] = x_ref[...]                                # real  -> rows [0, B)
    imgs_scr[RPAD:RPAD + B, :] = fake                            # fake  -> rows [8, 8+B)
    imgs = imgs_scr[...]                                         # (16, 1024)

    # conv lowered to a dense matmul (lane-dense 512-wide output) + LeakyReLU(0.2)
    conv = jnp.dot(imgs, wconv_ref[...], preferred_element_type=jnp.float32) + bconv_ref[...]
    act = jnp.where(conv > 0, conv, 0.2 * conv)                  # (16, 512)

    # FC(512 -> 1): elementwise mul with the weight row + lane reduction (XLU), no extra MXU op
    logits = jnp.sum(act * wd_ref[...], axis=1, keepdims=True) + bd_ref[...]   # (16, 1)

    # ---- BCE-with-logits losses (matches F.binary_cross_entropy_with_logits) ----
    rows = jax.lax.broadcasted_iota(jnp.int32, (STACK_ROWS, 1), 0)
    real_m = rows < B
    fake_m = jnp.logical_and(rows >= RPAD, rows < RPAD + B)

    sp_neg = _softplus(-logits)      # target = 1
    sp_pos = _softplus(logits)       # target = 0
    inv_b = 1.0 / B
    gen_loss = jnp.sum(jnp.where(fake_m, sp_neg, 0.0), keepdims=True) * inv_b   # D(fake) vs 1
    loss_real = jnp.sum(jnp.where(real_m, sp_neg, 0.0), keepdims=True) * inv_b  # D(real) vs 1
    loss_fake = jnp.sum(jnp.where(fake_m, sp_pos, 0.0), keepdims=True) * inv_b  # D(fake.detach()) vs 0
    disc_loss = (loss_real + loss_fake) * 0.5

    # pack the two scalars into one lane-dense (1, 128) store
    lane = jax.lax.broadcasted_iota(jnp.int32, (1, 128), 1)
    losses_ref[...] = jnp.where(lane == 0, gen_loss,
                                jnp.where(lane == 1, disc_loss, 0.0))


# ---------------- wrappers ----------------
def gan_pallas(x_flat, noise, p):
    return pl.pallas_call(
        gan_kernel,
        out_shape=(jax.ShapeDtypeStruct((B, IMG_FLAT), jnp.float32),   # fake image (flat)
                   jax.ShapeDtypeStruct((1, 128), jnp.float32)),       # [gen_loss, disc_loss, 0...]
        in_specs=[_VMEM] * 10,
        out_specs=(_VMEM, _VMEM),
        scratch_shapes=[pltpu.VMEM((STACK_ROWS, IMG_FLAT), jnp.float32)],
    )(x_flat, noise, p["g_w1"], p["g_b1"], p["g_w2"], p["g_b2"],
      p["d_wconv"], p["d_bconv"], p["d_wd"], p["d_bd"])


@jax.jit
def gan_forward(x, noise, params):
    x_flat = x.reshape(B, IMG_FLAT)                 # NCHW flatten (c, h, w) row-major
    fake_flat, losses = gan_pallas(x_flat, noise, params)
    fake = fake_flat.reshape(B, C, H, W)
    return fake, losses[0, 0], losses[0, 1]


def init_params(key):
    ks = jax.random.split(key, 4)
    std = 0.02
    g_w1 = std * jax.random.normal(ks[0], (Z_DIM, G_HID), jnp.float32)
    g_b1 = jnp.zeros((1, G_HID), jnp.float32)
    g_w2 = std * jax.random.normal(ks[1], (G_HID, IMG_FLAT), jnp.float32)
    g_b2 = jnp.zeros((1, IMG_FLAT), jnp.float32)

    # Conv2d weight in PyTorch layout (F, C, KH, KW), init N(0, 0.02) per GAN.initialize.
    wc = std * jax.random.normal(ks[2], (F_OUT, C, KH, KW), jnp.float32)
    # Lower the strided conv to a dense matmul once at init by applying it to the canonical
    # basis of flattened (C,H,W) images. Column order (f, oh, ow) == PyTorch flatten order.
    eye_imgs = jnp.eye(IMG_FLAT, dtype=jnp.float32).reshape(IMG_FLAT, C, H, W)
    conv_basis = jax.lax.conv_general_dilated(
        eye_imgs, wc, window_strides=(STRIDE, STRIDE),
        padding=((PAD, PAD), (PAD, PAD)),
        dimension_numbers=("NCHW", "OIHW", "NCHW"))            # (IMG_FLAT, F, OH, OW)
    d_wconv = conv_basis.reshape(IMG_FLAT, CONV_FLAT)          # (1024, 512)
    d_bconv = jnp.zeros((1, CONV_FLAT), jnp.float32)

    # Linear(F*OH*OW, 1) weight in PyTorch layout (1, F*OH*OW); used directly on the lane axis.
    d_wd = std * jax.random.normal(ks[3], (1, CONV_FLAT), jnp.float32)
    d_bd = jnp.zeros((1, 1), jnp.float32)

    return dict(g_w1=g_w1, g_b1=g_b1, g_w2=g_w2, g_b2=g_b2,
                d_wconv=d_wconv, d_bconv=d_bconv, d_wd=d_wd, d_bd=d_bd)


if __name__ == "__main__":
    key = jax.random.PRNGKey(0)
    k_param, k_x, k_noise = jax.random.split(key, 3)
    params = init_params(k_param)
    x = jax.random.normal(k_x, (B, C, H, W), jnp.float32)       # real images, NCHW
    # torch.randn(x.shape[0], generator.z_dim) equivalent, generated deterministically here
    noise = jax.random.normal(k_noise, (B, Z_DIM), jnp.float32)

    fake, gen_loss, disc_loss = gan_forward(x, noise, params)
    jax.block_until_ready((fake, gen_loss, disc_loss))

    assert fake.shape == (B, C, H, W)
    assert gen_loss.shape == () and disc_loss.shape == ()
    assert bool(jnp.isfinite(gen_loss)) and bool(jnp.isfinite(disc_loss))
    print("KERNEL_OK")
</pallas_src>

<mosaic_0001>
module attributes {stable_mosaic.version = 11 : i64} {
  func.func @gan_kernel(%arg0: memref<2x1024xf32, #tpu.memory_space<vmem>>, %arg1: memref<2x32xf32, #tpu.memory_space<vmem>>, %arg2: memref<32x64xf32, #tpu.memory_space<vmem>>, %arg3: memref<1x64xf32, #tpu.memory_space<vmem>>, %arg4: memref<64x1024xf32, #tpu.memory_space<vmem>>, %arg5: memref<1x1024xf32, #tpu.memory_space<vmem>>, %arg6: memref<1024x512xf32, #tpu.memory_space<vmem>>, %arg7: memref<1x512xf32, #tpu.memory_space<vmem>>, %arg8: memref<1x512xf32, #tpu.memory_space<vmem>>, %arg9: memref<1x1xf32, #tpu.memory_space<vmem>>, %arg10: memref<2x1024xf32, #tpu.memory_space<vmem>>, %arg11: memref<1x128xf32, #tpu.memory_space<vmem>>, %arg12: memref<16x1024xf32, #tpu.memory_space<vmem>>) attributes {dimension_semantics = [], scalar_prefetch = 0 : i64, scratch_operands = 1 : i64, tpu.core_type = #tpu.core_type<tc>} {
    %c0 = arith.constant 0 : index
    %c0_0 = arith.constant 0 : index
    %0 = vector.load %arg1[%c0, %c0_0] : memref<2x32xf32, #tpu.memory_space<vmem>>, vector<2x32xf32>
    %c0_1 = arith.constant 0 : index
    %c0_2 = arith.constant 0 : index
    %1 = vector.load %arg2[%c0_1, %c0_2] : memref<32x64xf32, #tpu.memory_space<vmem>>, vector<32x64xf32>
    %cst = arith.constant dense<0.000000e+00> : vector<2x64xf32>
    %2 = tpu.matmul %0, %1, %cst {dimension_numbers = #tpu.dot_dimension_numbers<[1], [0], [0], [1], [0, 0, 1, 1], [], []>} : vector<2x32xf32>, vector<32x64xf32>, vector<2x64xf32> -> vector<2x64xf32>
    %c0_3 = arith.constant 0 : index
    %c0_4 = arith.constant 0 : index
    %3 = vector.load %arg3[%c0_3, %c0_4] : memref<1x64xf32, #tpu.memory_space<vmem>>, vector<1x64xf32>
    %4 = vector.broadcast %3 : vector<1x64xf32> to vector<2x64xf32>
    %5 = arith.addf %2, %4 : vector<2x64xf32>
    %cst_5 = arith.constant 0.000000e+00 : f32
    %6 = vector.broadcast %cst_5 : f32 to vector<2x64xf32>
    %7 = arith.maximumf %5, %6 : vector<2x64xf32>
    %c0_6 = arith.constant 0 : index
    %c0_7 = arith.constant 0 : index
    %8 = vector.load %arg4[%c0_6, %c0_7] : memref<64x1024xf32, #tpu.memory_space<vmem>>, vector<64x1024xf32>
    %cst_8 = arith.constant dense<0.000000e+00> : vector<2x1024xf32>
    %9 = tpu.matmul %7, %8, %cst_8 {dimension_numbers = #tpu.dot_dimension_numbers<[1], [0], [0], [1], [0, 0, 1, 1], [], []>} : vector<2x64xf32>, vector<64x1024xf32>, vector<2x1024xf32> -> vector<2x1024xf32>
    %c0_9 = arith.constant 0 : index
    %c0_10 = arith.constant 0 : index
    %10 = vector.load %arg5[%c0_9, %c0_10] : memref<1x1024xf32, #tpu.memory_space<vmem>>, vector<1x1024xf32>
    %11 = vector.broadcast %10 : vector<1x1024xf32> to vector<2x1024xf32>
    %12 = arith.addf %9, %11 : vector<2x1024xf32>
    %13 = math.tanh %12 : vector<2x1024xf32>
    %c0_11 = arith.constant 0 : index
    %c0_12 = arith.constant 0 : index
    %14 = vector.load %arg10[%c0_11, %c0_12] : memref<2x1024xf32, #tpu.memory_space<vmem>>, vector<2x1024xf32>
    tpu.vector_store %arg10[%c0_11, %c0_12], %13 {strides = array<i32>} : memref<2x1024xf32, #tpu.memory_space<vmem>>, vector<2x1024xf32>,
    %cst_13 = arith.constant 0.000000e+00 : f32
    %15 = vector.broadcast %cst_13 : f32 to vector<16x1024xf32>
    %c0_14 = arith.constant 0 : index
    %c0_15 = arith.constant 0 : index
    %16 = vector.load %arg12[%c0_14, %c0_15] : memref<16x1024xf32, #tpu.memory_space<vmem>>, vector<16x1024xf32>
    tpu.vector_store %arg12[%c0_14, %c0_15], %15 {strides = array<i32>} : memref<16x1024xf32, #tpu.memory_space<vmem>>, vector<16x1024xf32>,
    %c0_16 = arith.constant 0 : index
    %c0_17 = arith.constant 0 : index
    %17 = vector.load %arg0[%c0_16, %c0_17] : memref<2x1024xf32, #tpu.memory_space<vmem>>, vector<2x1024xf32>
    %c0_18 = arith.constant 0 : index
    %c0_19 = arith.constant 0 : index
    %18 = vector.load %arg12[%c0_18, %c0_19] : memref<16x1024xf32, #tpu.memory_space<vmem>>, vector<2x1024xf32>
    tpu.vector_store %arg12[%c0_18, %c0_19], %17 {strides = array<i32>} : memref<16x1024xf32, #tpu.memory_space<vmem>>, vector<2x1024xf32>,
    %c8 = arith.constant 8 : index
    %c0_20 = arith.constant 0 : index
    %19 = vector.load %arg12[%c8, %c0_20] : memref<16x1024xf32, #tpu.memory_space<vmem>>, vector<2x1024xf32>
    tpu.vector_store %arg12[%c8, %c0_20], %13 {strides = array<i32>} : memref<16x1024xf32, #tpu.memory_space<vmem>>, vector<2x1024xf32>,
    %c0_21 = arith.constant 0 : index
    %c0_22 = arith.constant 0 : index
    %20 = vector.load %arg12[%c0_21, %c0_22] : memref<16x1024xf32, #tpu.memory_space<vmem>>, vector<16x1024xf32>
    %c0_23 = arith.constant 0 : index
    %c0_24 = arith.constant 0 : index
    %21 = vector.load %arg6[%c0_23, %c0_24] : memref<1024x512xf32, #tpu.memory_space<vmem>>, vector<1024x512xf32>
    %cst_25 = arith.constant dense<0.000000e+00> : vector<16x512xf32>
    %22 = tpu.matmul %20, %21, %cst_25 {dimension_numbers = #tpu.dot_dimension_numbers<[1], [0], [0], [1], [0, 0, 1, 1], [], []>} : vector<16x1024xf32>, vector<1024x512xf32>, vector<16x512xf32> -> vector<16x512xf32>
    %c0_26 = arith.constant 0 : index
    %c0_27 = arith.constant 0 : index
    %23 = vector.load %arg7[%c0_26, %c0_27] : memref<1x512xf32, #tpu.memory_space<vmem>>, vector<1x512xf32>
    %24 = vector.broadcast %23 : vector<1x512xf32> to vector<16x512xf32>
    %25 = arith.addf %22, %24 : vector<16x512xf32>
    %cst_28 = arith.constant 0.000000e+00 : f32
    %26 = vector.broadcast %cst_28 : f32 to vector<16x512xf32>
    %27 = arith.cmpf ogt, %25, %26 : vector<16x512xf32>
    %cst_29 = arith.constant 2.000000e-01 : f32
    %28 = vector.broadcast %cst_29 : f32 to vector<16x512xf32>
    %29 = arith.mulf %28, %25 : vector<16x512xf32>
    %30 = arith.select %27, %25, %29 : vector<16x512xi1>, vector<16x512xf32>
    %c0_30 = arith.constant 0 : index
    %c0_31 = arith.constant 0 : index
    %31 = vector.load %arg8[%c0_30, %c0_31] : memref<1x512xf32, #tpu.memory_space<vmem>>, vector<1x512xf32>
    %32 = vector.broadcast %31 : vector<1x512xf32> to vector<16x512xf32>
    %33 = arith.mulf %30, %32 : vector<16x512xf32>
    %cst_32 = arith.constant dense<0.000000e+00> : vector<16xf32>
    %34 = vector.multi_reduction <add>, %33, %cst_32 [1] : vector<16x512xf32> to vector<16xf32>
    %35 = vector.shape_cast %34 : vector<16xf32> to vector<16x1xf32>
    %c0_33 = arith.constant 0 : index
    %c0_34 = arith.constant 0 : index
    %36 = vector.load %arg9[%c0_33, %c0_34] : memref<1x1xf32, #tpu.memory_space<vmem>>, vector<1x1xf32>
    %37 = vector.broadcast %36 : vector<1x1xf32> to vector<16x1xf32>
    %38 = arith.addf %35, %37 : vector<16x1xf32>
    %39 = tpu.iota {dimensions = array<i32: 0>} : vector<16x1xi32>
    %c2_i32 = arith.constant 2 : i32
    %40 = vector.broadcast %c2_i32 : i32 to vector<16x1xi32>
    %41 = arith.cmpi slt, %39, %40 : vector<16x1xi32>
    %c8_i32 = arith.constant 8 : i32
    %42 = vector.broadcast %c8_i32 : i32 to vector<16x1xi32>
    %43 = arith.cmpi sge, %39, %42 : vector<16x1xi32>
    %c10_i32 = arith.constant 10 : i32
    %44 = vector.broadcast %c10_i32 : i32 to vector<16x1xi32>
    %45 = arith.cmpi slt, %39, %44 : vector<16x1xi32>
    %46 = arith.andi %43, %45 : vector<16x1xi1>
    %cst_35 = arith.constant 0.000000e+00 : f32
    %47 = vector.broadcast %cst_35 : f32 to vector<16x1xf32>
    %48 = arith.subf %47, %38 : vector<16x1xf32>
    %cst_36 = arith.constant 0.000000e+00 : f32
    %49 = vector.broadcast %cst_36 : f32 to vector<16x1xf32>
    %50 = arith.maximumf %48, %49 : vector<16x1xf32>
    %51 = math.absf %48 : vector<16x1xf32>
    %cst_37 = arith.constant 0.000000e+00 : f32
    %52 = vector.broadcast %cst_37 : f32 to vector<16x1xf32>
    %53 = arith.subf %52, %51 : vector<16x1xf32>
    %54 = math.exp %53 : vector<16x1xf32>
    %55 = math.log1p %54 : vector<16x1xf32>
    %56 = arith.addf %50, %55 : vector<16x1xf32>
    %cst_38 = arith.constant 0.000000e+00 : f32
    %57 = vector.broadcast %cst_38 : f32 to vector<16x1xf32>
    %58 = arith.maximumf %38, %57 : vector<16x1xf32>
    %59 = math.absf %38 : vector<16x1xf32>
    %cst_39 = arith.constant 0.000000e+00 : f32
    %60 = vector.broadcast %cst_39 : f32 to vector<16x1xf32>
    %61 = arith.subf %60, %59 : vector<16x1xf32>
    %62 = math.exp %61 : vector<16x1xf32>
    %63 = math.log1p %62 : vector<16x1xf32>
    %64 = arith.addf %58, %63 : vector<16x1xf32>
    %cst_40 = arith.constant 0.000000e+00 : f32
    %65 = vector.broadcast %cst_40 : f32 to vector<16x1xf32>
    %66 = arith.select %46, %56, %65 : vector<16x1xi1>, vector<16x1xf32>
    %67 = vector.shape_cast %66 : vector<16x1xf32> to vector<1x16x1xf32>
    %cst_41 = arith.constant dense<0.000000e+00> : vector<1xf32>
    %68 = vector.multi_reduction <add>, %67, %cst_41 [1, 2] : vector<1x16x1xf32> to vector<1xf32>
    %69 = vector.shape_cast %68 : vector<1xf32> to vector<1x1x1xf32>
    %70 = vector.extract %69[0, 0, 0] : f32 from vector<1x1x1xf32>
    %71 = vector.broadcast %70 : f32 to vector<1x1xf32>
    %cst_42 = arith.constant 5.000000e-01 : f32
    %72 = vector.broadcast %cst_42 : f32 to vector<1x1xf32>
    %73 = arith.mulf %71, %72 : vector<1x1xf32>
    %cst_43 = arith.constant 0.000000e+00 : f32
    %74 = vector.broadcast %cst_43 : f32 to vector<16x1xf32>
    %75 = arith.select %41, %56, %74 : vector<16x1xi1>, vector<16x1xf32>
    %76 = vector.shape_cast %75 : vector<16x1xf32> to vector<1x16x1xf32>
    %cst_44 = arith.constant dense<0.000000e+00> : vector<1xf32>
    %77 = vector.multi_reduction <add>, %76, %cst_44 [1, 2] : vector<1x16x1xf32> to vector<1xf32>
    %78 = vector.shape_cast %77 : vector<1xf32> to vector<1x1x1xf32>
    %79 = vector.extract %78[0, 0, 0] : f32 from vector<1x1x1xf32>
    %80 = vector.broadcast %79 : f32 to vector<1x1xf32>
    %cst_45 = arith.constant 5.000000e-01 : f32
    %81 = vector.broadcast %cst_45 : f32 to vector<1x1xf32>
    %82 = arith.mulf %80, %81 : vector<1x1xf32>
    %cst_46 = arith.constant 0.000000e+00 : f32
    %83 = vector.broadcast %cst_46 : f32 to vector<16x1xf32>
    %84 = arith.select %46, %64, %83 : vector<16x1xi1>, vector<16x1xf32>
    %85 = vector.shape_cast %84 : vector<16x1xf32> to vector<1x16x1xf32>
    %cst_47 = arith.constant dense<0.000000e+00> : vector<1xf32>
    %86 = vector.multi_reduction <add>, %85, %cst_47 [1, 2] : vector<1x16x1xf32> to vector<1xf32>
    %87 = vector.shape_cast %86 : vector<1xf32> to vector<1x1x1xf32>
    %88 = vector.extract %87[0, 0, 0] : f32 from vector<1x1x1xf32>
    %89 = vector.broadcast %88 : f32 to vector<1x1xf32>
    %cst_48 = arith.constant 5.000000e-01 : f32
    %90 = vector.broadcast %cst_48 : f32 to vector<1x1xf32>
    %91 = arith.mulf %89, %90 : vector<1x1xf32>
    %92 = arith.addf %82, %91 : vector<1x1xf32>
    %cst_49 = arith.constant 5.000000e-01 : f32
    %93 = vector.broadcast %cst_49 : f32 to vector<1x1xf32>
    %94 = arith.mulf %92, %93 : vector<1x1xf32>
    %95 = tpu.iota {dimensions = array<i32: 1>} : vector<1x128xi32>
    %c0_i32 = arith.constant 0 : i32
    %96 = vector.broadcast %c0_i32 : i32 to vector<1x128xi32>
    %97 = arith.cmpi eq, %95, %96 : vector<1x128xi32>
    %c1_i32 = arith.constant 1 : i32
    %98 = vector.broadcast %c1_i32 : i32 to vector<1x128xi32>
    %99 = arith.cmpi eq, %95, %98 : vector<1x128xi32>
    %cst_50 = arith.constant 0.000000e+00 : f32
    %100 = vector.shape_cast %94 : vector<1x1xf32> to vector<1x1xf32>
    %101 = vector.broadcast %100 : vector<1x1xf32> to vector<1x128xf32>
    %102 = vector.broadcast %cst_50 : f32 to vector<1x128xf32>
    %103 = arith.select %99, %101, %102 : vector<1x128xi1>, vector<1x128xf32>
    %104 = vector.shape_cast %73 : vector<1x1xf32> to vector<1x1xf32>
    %105 = vector.broadcast %104 : vector<1x1xf32> to vector<1x128xf32>
    %106 = arith.select %97, %105, %103 : vector<1x128xi1>, vector<1x128xf32>
    %c0_51 = arith.constant 0 : index
    %c0_52 = arith.constant 0 : index
    %107 = vector.load %arg11[%c0_51, %c0_52] : memref<1x128xf32, #tpu.memory_space<vmem>>, vector<1x128xf32>
    tpu.vector_store %arg11[%c0_51, %c0_52], %106 {strides = array<i32>} : memref<1x128xf32, #tpu.memory_space<vmem>>, vector<1x128xf32>,
    return
  }
}

</mosaic_0001>

<bundles_post_ra>
// kernel: gan_forward.1
= control target key start
LH: loop header
LB: loop body
LE: loop exit
PB: predicated region body
PF: predicated region fallthrough
CT: control target
= control target key end

     0   :  { %s2624_s0 = inlined_call_operand.vmem [shape: f32[2,1024], index: 0, kind: input, shape index: {}]   ;;  %s2625_s1 = inlined_call_operand.hbm [shape: f32[2,32], index: 1, kind: input, shape index: {}]   ;;  %s2626_s2 = inlined_call_operand.hbm [shape: f32[32,64], index: 2, kind: input, shape index: {}]   ;;  %s2627_s3 = inlined_call_operand.hbm [shape: f32[1,64], index: 3, kind: input, shape index: {}]   ;;  %s2628_s4 = inlined_call_operand.hbm [shape: f32[64,1024], index: 4, kind: input, shape index: {}]   ;;  %s2629_s5 = inlined_call_operand.hbm [shape: f32[1,1024], index: 5, kind: input, shape index: {}]   ;;  %s2630_s6 = inlined_call_operand.hbm [shape: f32[1024,512], index: 6, kind: input, shape index: {}]   ;;  %s2631_s7 = inlined_call_operand.hbm [shape: f32[1,512], index: 7, kind: input, shape index: {}]   ;;  %s2632_s8 = inlined_call_operand.hbm [shape: f32[1,512], index: 8, kind: input, shape index: {}]   ;;  %s2633_s9 = inlined_call_operand.<no memory space> [shape: f32[1,1], index: 9, kind: input, shape index: {}]   ;;  %s2634_s10 = inlined_call_operand.vmem [shape: f32[2,1024], index: 10, kind: output, shape index: {0}]   ;;  %s2635_s11 = inlined_call_operand.vmem [shape: f32[1,128], index: 11, kind: output, shape index: {1}]  }
   0x1   :  { %v17_v0 = vstv %s2633_s9 }
   0x2   :  { %18 = vst [vmem:[#allocation3] sm:$0x1] %v17_v0 }
   0x3   :  { %19 = vsyncpa [#allocation5], 0 }
   0x4   :  { %20 = vsyncpa [#allocation7], 0 }
   0x5   :  { %21 = vsyncpa [#allocation10], 0 }
   0x6   :  { %22 = vsyncpa [#allocation13], 0 }
   0x7   :  { %23 = vsyncpa [#allocation16], 0  ;;  %s2390_s19 = smov [#allocation6]  }
   0x8   :  { %s41_s20 = sshll.u32 %s2390_s19, 4  ;;  %s42_s20 = int_to_ptr.vmem [resolvable:$true] %s41_s20 }
   0x9   :  { %s2228_s21 = scalar_lea.vmem %s42_s20, 512  ;;  %p2233_p1 = scmp.lt.s32.totalorder %s42_s20, %s42_s20 }
   0xa   :  { %p2229_p0 = scmp.ne.s32.totalorder %s42_s20, %s2228_s21  ;;  %p2234_p2 = scmp.lt.s32.totalorder %s2228_s21, %s2228_s21 }
   0xc   :  { %p2235_p3 = por %p2234_p2, %p2233_p1 }
   0xe   :  { %p2236_p4 = pnand %p2235_p3, %p2229_p0 }
  0x10   :  { %2239 = shalt.err (!%p2236_p4)
}
  0x11   :  { %s2391_s22 = smov 128   ;;  %s2392_s23 = smov 8  }
  0x12   :  { %47 = dma.hbm_to_vmem [thread:$0]  %s2626_s2, 512, %s42_s20, [#allocation7], %s2391_s22, %s2391_s22, %s2392_s23  }
  0x13   :  { %s2393_s25 = smov [#allocation9]  }
  0x14   :  { %s63_s26 = sshll.u32 %s2393_s25, 4  ;;  %s64_s26 = int_to_ptr.vmem [resolvable:$true] %s63_s26 }
  0x15   :  { %s2248_s27 = scalar_lea.vmem %s64_s26, 8192  ;;  %p2253_p6 = scmp.lt.s32.totalorder %s64_s26, %s64_s26 }
  0x16   :  { %p2249_p5 = scmp.ne.s32.totalorder %s64_s26, %s2248_s27  ;;  %p2254_p7 = scmp.lt.s32.totalorder %s2248_s27, %s2248_s27 }
  0x18   :  { %p2255_p8 = por %p2254_p7, %p2253_p6 }
  0x1a   :  { %p2256_p9 = pnand %p2255_p8, %p2249_p5 }
  0x1c   :  { %2259 = shalt.err (!%p2256_p9)
}
  0x1d   :  { %s2394_s28 = smov 1024   ;;  %s2395_s29 = smov 64  }
  0x1e   :  { %69 = dma.hbm_to_vmem [thread:$0]  %s2628_s4, 8192, %s64_s26, [#allocation10], %s2394_s28, %s2394_s28, %s2395_s29  }
  0x1f   :  { %s2396_s13 = smov [#allocation12]  }
  0x20   :  { %s85_s14 = sshll.u32 %s2396_s13, 4  ;;  %s86_s14 = int_to_ptr.vmem [resolvable:$true] %s85_s14 }
  0x21   :  { %s2268_s2 = scalar_lea.vmem %s86_s14, 65536  ;;  %p2273_p11 = scmp.lt.s32.totalorder %s86_s14, %s86_s14 }
  0x22   :  { %p2269_p10 = scmp.ne.s32.totalorder %s86_s14, %s2268_s2  ;;  %p2274_p12 = scmp.lt.s32.totalorder %s2268_s2, %s2268_s2 }
  0x24   :  { %p2275_p13 = por %p2274_p12, %p2273_p11 }
  0x26   :  { %p2276_p0 = pnand %p2275_p13, %p2269_p10 }
  0x28   :  { %2279 = shalt.err (!%p2276_p0)
}
  0x29   :  { %s2397_s15 = smov 512   ;;  %s2398_s16 = smov 32  }
  0x2a   :  { %91 = dma.hbm_to_vmem [thread:$0]  %s2630_s6, 65536, %s86_s14, [#allocation13], %s2397_s15, %s2397_s15, %s2398_s16  }
  0x2b   :  { %s2399_s19 = smov [#allocation4]   ;;  %s2400_s4 = smov [#allocation8]  }
  0x2c   :  { %s32_s20 = sshll.u32 %s2399_s19, 4  ;;  %s54_s21 = sshll.u32 %s2400_s4, 4  ;;  %s33_s20 = int_to_ptr.vmem [resolvable:$true] %s32_s20  ;;  %s55_s21 = int_to_ptr.vmem [resolvable:$true] %s54_s21 }
  0x2d   :  { %s2288_s22 = scalar_lea.vmem %s33_s20, 32  ;;  %p2293_p2 = scmp.lt.s32.totalorder %s33_s20, %s33_s20 }
  0x2e   :  { %p2289_p1 = scmp.ne.s32.totalorder %s33_s20, %s2288_s22  ;;  %p2294_p3 = scmp.lt.s32.totalorder %s2288_s22, %s2288_s22 }
  0x30   :  { %p2295_p4 = por %p2294_p3, %p2293_p2 }
  0x32   :  { %p2296_p5 = pnand %p2295_p4, %p2289_p1 }
  0x34   :  { %2299 = shalt.err (!%p2296_p5)
}
  0x35   :  { %35 = dma.hbm_to_vmem [thread:$0]  %s2625_s1, 32, %s33_s20, [#allocation5]  }
  0x36   :  { %s2308_s9 = scalar_lea.vmem %s55_s21, 16  ;;  %s2312_s6 = scalar_lea.vmem %s55_s21, 32 }
  0x37   :  { %p2309_p6 = scmp.ne.s32.totalorder %s55_s21, %s2308_s9  ;;  %p2313_p7 = scmp.lt.s32.totalorder %s55_s21, %s55_s21 }
  0x38   :  { %p2314_p8 = scmp.lt.s32.totalorder %s2312_s6, %s2308_s9 }
  0x3a   :  { %p2315_p9 = por %p2314_p8, %p2313_p7 }
  0x3c   :  { %p2316_p10 = pnand %p2315_p9, %p2309_p6 }
  0x3e   :  { %2319 = shalt.err (!%p2316_p10)
}
  0x3f   :  { %57 = dma.hbm_to_vmem [thread:$0]  %s2627_s3, 16, %s55_s21, [#allocation7]  }
  0x40   :  { %s2401_s27 = smov [#allocation11]   ;;  %s2402_s29 = smov [#allocation14]  }
  0x41   :  { %s76_s28 = sshll.u32 %s2401_s27, 4  ;;  %s98_s30 = sshll.u32 %s2402_s29, 4  ;;  %s77_s28 = int_to_ptr.vmem [resolvable:$true] %s76_s28  ;;  %s99_s30 = int_to_ptr.vmem [resolvable:$true] %s98_s30 }
  0x42   :  { %s2328_s12 = scalar_lea.vmem %s77_s28, 128  ;;  %p2333_p12 = scmp.lt.s32.totalorder %s77_s28, %s77_s28 }
  0x43   :  { %p2329_p11 = scmp.ne.s32.totalorder %s77_s28, %s2328_s12  ;;  %p2334_p13 = scmp.lt.s32.totalorder %s2328_s12, %s2328_s12 }
  0x45   :  { %p2335_p0 = por %p2334_p13, %p2333_p12 }
  0x47   :  { %p2336_p1 = pnand %p2335_p0, %p2329_p11 }
  0x49   :  { %2339 = shalt.err (!%p2336_p1)
}
  0x4a   :  { %79 = dma.hbm_to_vmem [thread:$0]  %s2629_s5, 128, %s77_s28, [#allocation10]  }
  0x4b   :  { %s2348_s14 = scalar_lea.vmem %s99_s30, 64  ;;  %p2353_p3 = scmp.lt.s32.totalorder %s99_s30, %s99_s30 }
  0x4c   :  { %p2349_p2 = scmp.ne.s32.totalorder %s99_s30, %s2348_s14  ;;  %p2354_p4 = scmp.lt.s32.totalorder %s2348_s14, %s2348_s14 }
  0x4e   :  { %p2355_p5 = por %p2354_p4, %p2353_p3 }
  0x50   :  { %p2356_p6 = pnand %p2355_p5, %p2349_p2 }
  0x52   :  { %2359 = shalt.err (!%p2356_p6)
}
  0x53   :  { %101 = dma.hbm_to_vmem [thread:$0]  %s2631_s7, 64, %s99_s30, [#allocation13]  }
  0x54   :  { %s2403_s15 = smov [#allocation15]  }
  0x55   :  { %s108_s16 = sshll.u32 %s2403_s15, 4  ;;  %s109_s16 = int_to_ptr.vmem [resolvable:$true] %s108_s16 }
  0x56   :  { %s2368_s17 = scalar_lea.vmem %s109_s16, 64  ;;  %p2373_p8 = scmp.lt.s32.totalorder %s109_s16, %s109_s16 }
  0x57   :  { %p2369_p7 = scmp.ne.s32.totalorder %s109_s16, %s2368_s17  ;;  %p2374_p9 = scmp.lt.s32.totalorder %s2368_s17, %s2368_s17 }
  0x59   :  { %p2375_p10 = por %p2374_p9, %p2373_p8 }
  0x5b   :  { %p2376_p11 = pnand %p2375_p10, %p2369_p7 }
  0x5d   :  { %2379 = shalt.err (!%p2376_p11)
}
  0x5e   :  { %111 = dma.hbm_to_vmem [thread:$0]  %s2632_s8, 64, %s109_s16, [#allocation16]  }
  0x5f   :  { %2380 = dma.done.wait [#allocation5], 32  }
  0x60   :  { %2381 = vsyncadd [#allocation5], 4294967264 }
  0x61   :  { %2382 = dma.done.wait [#allocation7], 528  }
  0x62   :  { %2383 = vsyncadd [#allocation7], 4294966768 }
  0x63   :  { %2384 = dma.done.wait [#allocation10], 8320  }
  0x64   :  { %2385 = vsyncadd [#allocation10], 4294958976 }
  0x65   :  { %2386 = dma.done.wait [#allocation13], 65600  }
  0x66   :  { %2387 = vsyncadd [#allocation13], 4294901696 }
  0x67   :  { %2388 = dma.done.wait [#allocation16], 64  }
  0x68   :  { %2389 = vsyncadd [#allocation16], 4294967232  ;;  %v2404_v1 = vmov 0.0   ;;  %vm2405_vm0 = vmmov 0   ;;  %v142_v2 = vld [vmem:[#allocation6 + $0x18] sm:$0xff]  ;;  %v141_v3 = vld [vmem:[#allocation6 + $0x10] sm:$0xff]  ;;  %v291_v41 = vlaneseq }
  0x69   :  { %2150 = vmatprep.subr.mxu0 %v2404_v1  ;;  %673 = vst [vmem:[#allocation2] sm:$0xff] %v2404_v1  ;;  %674 = vst [vmem:[#allocation2 + $0x8] sm:$0xff] %v2404_v1  ;;  %2158 = vmatprep.mubr.msk.f32.mxu0 %vm2405_vm0, %v2404_v1  ;;  %v282_v4 = vld [vmem:[#allocation9 + $0x1c8] sm:$0xff]  ;;  %v281_v6 = vld [vmem:[#allocation9 + $0x1c0] sm:$0xff]  ;;  %vm150_vm1 = vcmask 261120   ;;  %vm331_vm2 = vcmask 523264  }
  0x6a   :  { %675 = vst [vmem:[#allocation2 + $0x10] sm:$0xff] %v2404_v1  ;;  %676 = vst [vmem:[#allocation2 + $0x18] sm:$0xff] %v2404_v1  ;;  %399 = vmatprep.mubr.f32.mxu1 %v2404_v1  ;;  %2151 = vmatpush3.msra.mxu0 %v142_v2  ;;  %v140_v5 = vld [vmem:[#allocation6 + $0x8] sm:$0xff]  ;;  %v139_v9 = vld [vmem:[#allocation6] sm:$0xff]  ;;  %v2406_v43 = vmov 1983009808  }
  0x6b   :  { %677 = vst [vmem:[#allocation2 + $0x20] sm:$0xff] %v2404_v1  ;;  %678 = vst [vmem:[#allocation2 + $0x28] sm:$0xff] %v2404_v1  ;;  %2152 = vmatprep.subr.mxu0 %v2404_v1  ;;  %351 = vmatprep.subr.mxu1 %v282_v4  ;;  %v274_v7 = vld [vmem:[#allocation9 + $0x188] sm:$0xff]  ;;  %v273_v8 = vld [vmem:[#allocation9 + $0x180] sm:$0xff]  ;;  %v638_v44 = vunpack.c.l.s4 %v2406_v43  ;;  %v2521_v46 = vshrl.u32 %v291_v41, 7  ;;  %vm2065_vm15 = vcmask 7168  }
  0x6c   :  { %679 = vst [vmem:[#allocation2 + $0x30] sm:$0xff] %v2404_v1  ;;  %680 = vst [vmem:[#allocation2 + $0x38] sm:$0xff] %v2404_v1  ;;  %2153 = vmatpush3.msra.mxu0 %v141_v3  ;;  %352 = vmatpush1.msra.mxu1 %v281_v6  ;;  %v266_v10 = vld [vmem:[#allocation9 + $0x148] sm:$0xff]  ;;  %v138_v11 = vld [vmem:[#allocation4] sm:$0x3] }
  0x6d   :  { %681 = vst [vmem:[#allocation2 + $0x40] sm:$0xff] %v2404_v1  ;;  %682 = vst [vmem:[#allocation2 + $0x48] sm:$0xff] %v2404_v1  ;;  %2154 = vmatprep.subr.mxu0 %v2404_v1  ;;  %353 = vmatprep.subr.mxu1 %v274_v7  ;;  %v284_v12 = vld [vmem:[#allocation9 + $0x1d8] sm:$0xff]  ;;  %v265_v13 = vld [vmem:[#allocation9 + $0x140] sm:$0xff]  ;;  %v639_v47 = vunpack.c.0.s8 %v638_v44  ;;  %vm1993_vm0 = vcmp.lt.s32.totalorder %v2521_v46, 2 }
  0x6e   :  { %683 = vst [vmem:[#allocation2 + $0x50] sm:$0xff] %v2404_v1  ;;  %684 = vst [vmem:[#allocation2 + $0x58] sm:$0xff] %v2404_v1  ;;  %2155 = vmatpush3.msra.mxu0 %v140_v5  ;;  %354 = vmatpush1.msra.mxu1 %v273_v8  ;;  %v283_v14 = vld [vmem:[#allocation9 + $0x1d0] sm:$0xff]  ;;  %v258_v15 = vld [vmem:[#allocation9 + $0x108] sm:$0xff] }
  0x6f   :  { %685 = vst [vmem:[#allocation2 + $0x60] sm:$0xff] %v2404_v1  ;;  %686 = vst [vmem:[#allocation2 + $0x68] sm:$0xff] %v2404_v1  ;;  %2156 = vmatprep.subr.mxu0 %v2404_v1  ;;  %355 = vmatprep.subr.mxu1 %v266_v10  ;;  %v276_v16 = vld [vmem:[#allocation9 + $0x198] sm:$0xff]  ;;  %v257_v17 = vld [vmem:[#allocation9 + $0x100] sm:$0xff]  ;;  %v2524_v48 = vsub.s32 %v639_v47, %v2521_v46 }
  0x70   :  { %687 = vst [vmem:[#allocation2 + $0x70] sm:$0xff] %v2404_v1  ;;  %688 = vst [vmem:[#allocation2 + $0x78] sm:$0xff] %v2404_v1  ;;  %2157 = vmatpush3.msra.mxu0 %v139_v9  ;;  %356 = vmatpush1.msra.mxu1 %v265_v13  ;;  %v275_v18 = vld [vmem:[#allocation9 + $0x190] sm:$0xff]  ;;  %v250_v19 = vld [vmem:[#allocation9 + $0xc8] sm:$0xff] }
  0x71   :  { %2159 = vmatmul.mubr.msk.f32.vlgmr.msra.gmra.mxu0 %vm150_vm1, %v138_v11  ;;  %422 = vmatprep.subr.mxu0 %v284_v12  ;;  %v268_v20 = vld [vmem:[#allocation9 + $0x158] sm:$0xff]  ;;  %v249_v21 = vld [vmem:[#allocation9 + $0xc0] sm:$0xff]  ;;  %v267_v22 = vld [vmem:[#allocation9 + $0x150] sm:$0xff] }
  0x72   :  { %423 = vmatpush1.msra.mxu0 %v283_v14  ;;  %357 = vmatprep.subr.mxu1 %v258_v15  ;;  %v242_v23 = vld [vmem:[#allocation9 + $0x88] sm:$0xff]  ;;  %v260_v24 = vld [vmem:[#allocation9 + $0x118] sm:$0xff]  ;;  %v241_v25 = vld [vmem:[#allocation9 + $0x80] sm:$0xff] }
  0x73   :  { %424 = vmatprep.subr.mxu0 %v276_v16  ;;  %358 = vmatpush1.msra.mxu1 %v257_v17  ;;  %v259_v26 = vld [vmem:[#allocation9 + $0x110] sm:$0xff]  ;;  %v252_v27 = vld [vmem:[#allocation9 + $0xd8] sm:$0xff]  ;;  %v234_v31 = vld [vmem:[#allocation9 + $0x48] sm:$0xff] }
  0x74   :  { %425 = vmatpush1.msra.mxu0 %v275_v18  ;;  %359 = vmatprep.subr.mxu1 %v250_v19  ;;  %v251_v28 = vld [vmem:[#allocation9 + $0xd0] sm:$0xff]  ;;  %v244_v29 = vld [vmem:[#allocation9 + $0x98] sm:$0xff]  ;;  %v233_v33 = vld [vmem:[#allocation9 + $0x40] sm:$0xff] }
  0x75   :  { %426 = vmatprep.subr.mxu0 %v268_v20  ;;  %360 = vmatpush1.msra.mxu1 %v249_v21  ;;  %v243_v30 = vld [vmem:[#allocation9 + $0x90] sm:$0xff]  ;;  %v236_v32 = vld [vmem:[#allocation9 + $0x58] sm:$0xff]  ;;  %v226_v35 = vld [vmem:[#allocation9 + $0x8] sm:$0xff] }
  0x76   :  { %427 = vmatpush1.msra.mxu0 %v267_v22  ;;  %361 = vmatprep.subr.mxu1 %v242_v23  ;;  %v235_v34 = vld [vmem:[#allocation9 + $0x50] sm:$0xff]  ;;  %v228_v36 = vld [vmem:[#allocation9 + $0x18] sm:$0xff]  ;;  %v225_v37 = vld [vmem:[#allocation9] sm:$0xff] }
  0x77   :  { %428 = vmatprep.subr.mxu0 %v260_v24  ;;  %362 = vmatpush1.msra.mxu1 %v241_v25  ;;  %v227_v38 = vld [vmem:[#allocation9 + $0x10] sm:$0xff]  ;;  %v286_v39 = vld [vmem:[#allocation9 + $0x1e8] sm:$0xff]  ;;  %v288_v40 = vld [vmem:[#allocation9 + $0x1f8] sm:$0xff] }
  0x78   :  { %429 = vmatpush1.msra.mxu0 %v259_v26  ;;  %470 = vmatprep.mubr.f32.mxu0 %v2404_v1  ;;  %v689_v42 = vld [vmem:[%s2624_s0] sm:$0xff]  ;;  %v287_v59 = vld [vmem:[#allocation9 + $0x1f0] sm:$0xff]  ;;  %v278_v60 = vld [vmem:[#allocation9 + $0x1a8] sm:$0xff] }
  0x79   :  { %430 = vmatprep.subr.mxu0 %v252_v27  ;;  %363 = vmatprep.subr.mxu1 %v234_v31  ;;  %2140 = vst.sshfl [vmem:[#allocation2] sm:$0x3 pattern:$0x76325410] %v689_v42  ;;  %v693_v45 = vcombine.high %v689_v42, %v689_v42  ;;  %v700_v49 = vrot.slane %v689_v42, %v2524_v48  ;;  %v2134_v53 = vld [vmem:[#allocation8] ss:$0 sm:$0xff] }
  0x7a   :  { %431 = vmatpush1.msra.mxu0 %v251_v28  ;;  %364 = vmatpush1.msra.mxu1 %v233_v33  ;;  %v285_v58 = vld [vmem:[#allocation9 + $0x1e0] sm:$0xff]  ;;  %v280_v61 = vld [vmem:[#allocation9 + $0x1b8] sm:$0xff]  ;;  %v279_v63 = vld [vmem:[#allocation9 + $0x1b0] sm:$0xff] }
  0x7b   :  { %432 = vmatprep.subr.mxu0 %v244_v29  ;;  %365 = vmatprep.subr.mxu1 %v226_v35  ;;  %2141 = vst.sshfl [vmem:[#allocation2 + $0x10] sm:$0x3 pattern:$0x76325410] %v693_v45  ;;  %v707_v50 = vrot.slane %v693_v45, %v2524_v48  ;;  %v708_v51 = vcombine.high %v700_v49, %v700_v49  ;;  %v277_v62 = vld [vmem:[#allocation9 + $0x1a0] sm:$0xff]  ;;  %v270_v0 = vld [vmem:[#allocation9 + $0x168] sm:$0xff] }
  0x7c   :  { %433 = vmatpush1.msra.mxu0 %v243_v30  ;;  %366 = vmatpush1.msra.mxu1 %v225_v37  ;;  %v272_v2 = vld [vmem:[#allocation9 + $0x178] sm:$0xff]  ;;  %v269_v3 = vld [vmem:[#allocation9 + $0x160] sm:$0xff]  ;;  %v271_v4 = vld [vmem:[#allocation9 + $0x170] sm:$0xff] }
  0x7d   :  { %434 = vmatprep.subr.mxu0 %v236_v32  ;;  %493 = vmatprep.subr.mxu1 %v286_v39  ;;  %v709_v52 = vcombine.high %v707_v50, %v707_v50  ;;  %736 = vst [vmem:[#allocation2 + $0x8] sm:$0x3] %v708_v51  ;;  %v262_v5 = vld [vmem:[#allocation9 + $0x128] sm:$0xff]  ;;  %v264_v6 = vld [vmem:[#allocation9 + $0x138] sm:$0xff]  ;;  %v261_v7 = vld [vmem:[#allocation9 + $0x120] sm:$0xff] }
  0x7e   :  { %435 = vmatpush1.msra.mxu0 %v235_v34  ;;  %v263_v8 = vld [vmem:[#allocation9 + $0x130] sm:$0xff]  ;;  %v254_v9 = vld [vmem:[#allocation9 + $0xe8] sm:$0xff]  ;;  %v256_v10 = vld [vmem:[#allocation9 + $0xf8] sm:$0xff] }
  0x7f   :  { %436 = vmatprep.subr.mxu0 %v228_v36  ;;  %738 = vst [vmem:[#allocation2 + $0x18] sm:$0x3] %v709_v52  ;;  %v253_v11 = vld [vmem:[#allocation9 + $0xe0] sm:$0xff]  ;;  %v255_v12 = vld [vmem:[#allocation9 + $0xf0] sm:$0xff]  ;;  %v246_v13 = vld [vmem:[#allocation9 + $0xa8] sm:$0xff] }
  0x80   :  { %437 = vmatpush1.msra.mxu0 %v227_v38  ;;  %v248_v14 = vld [vmem:[#allocation9 + $0xb8] sm:$0xff]  ;;  %v245_v15 = vld [vmem:[#allocation9 + $0xa0] sm:$0xff]  ;;  %v247_v16 = vld [vmem:[#allocation9 + $0xb0] sm:$0xff] }
  0x81   :  { %564 = vmatprep.subr.mxu0 %v288_v40  ;;  %v238_v17 = vld [vmem:[#allocation9 + $0x68] sm:$0xff]  ;;  %v240_v18 = vld [vmem:[#allocation9 + $0x78] sm:$0xff]  ;;  %v237_v19 = vld [vmem:[#allocation9 + $0x60] sm:$0xff] }
  0x82   :  { %v239_v20 = vld [vmem:[#allocation9 + $0x70] sm:$0xff]  ;;  %v230_v21 = vld [vmem:[#allocation9 + $0x28] sm:$0xff]  ;;  %v232_v22 = vld [vmem:[#allocation9 + $0x38] sm:$0xff] }
  0x83   :  { %v229_v23 = vld [vmem:[#allocation9 + $0x20] sm:$0xff]  ;;  %v231_v24 = vld [vmem:[#allocation9 + $0x30] sm:$0xff]  ;;  %v827_v27 = vld [vmem:[#allocation12 + $0x1e0] sm:$0xff] }
  0x84   :  { %v828_v25 = vld [vmem:[#allocation12 + $0x1e8] sm:$0xff]  ;;  %v955_v28 = vld [vmem:[#allocation12 + $0x5e0] sm:$0xff] }
  0x85   :  { %v956_v26 = vld [vmem:[#allocation12 + $0x5e8] sm:$0xff]  ;;  %v823_v31 = vld [vmem:[#allocation12 + $0x1c0] sm:$0xff] }
  0x86   :  { %v824_v29 = vld [vmem:[#allocation12 + $0x1c8] sm:$0xff]  ;;  %v951_v32 = vld [vmem:[#allocation12 + $0x5c0] sm:$0xff] }
  0x87   :  { %v952_v30 = vld [vmem:[#allocation12 + $0x5c8] sm:$0xff]  ;;  %v947_v35 = vld [vmem:[#allocation12 + $0x5a0] sm:$0xff] }
  0x88   :  { %v820_v33 = vld [vmem:[#allocation12 + $0x1a8] sm:$0xff]  ;;  %v815_v38 = vld [vmem:[#allocation12 + $0x180] sm:$0xff] }
  0x89   :  { %v948_v34 = vld [vmem:[#allocation12 + $0x5a8] sm:$0xff]  ;;  %v943_v39 = vld [vmem:[#allocation12 + $0x580] sm:$0xff] }
  0x8a   :  { %v816_v36 = vld [vmem:[#allocation12 + $0x188] sm:$0xff]  ;;  %v811_v43 = vld [vmem:[#allocation12 + $0x160] sm:$0xff] }
  0x8b   :  { %v944_v37 = vld [vmem:[#allocation12 + $0x588] sm:$0xff]  ;;  %v939_v44 = vld [vmem:[#allocation12 + $0x560] sm:$0xff] }
  0x8c   :  { %v812_v40 = vld [vmem:[#allocation12 + $0x168] sm:$0xff]  ;;  %v807_v49 = vld [vmem:[#allocation12 + $0x140] sm:$0xff] }
  0x8d   :  { %v940_v42 = vld [vmem:[#allocation12 + $0x568] sm:$0xff]  ;;  %v935_v50 = vld [vmem:[#allocation12 + $0x540] sm:$0xff] }
  0x8e   :  { %v808_v45 = vld [vmem:[#allocation12 + $0x148] sm:$0xff] }
  0x8f   :  { %v936_v47 = vld [vmem:[#allocation12 + $0x548] sm:$0xff] }
  0x90   :  { %v804_v51 = vld [vmem:[#allocation12 + $0x128] sm:$0xff] }
  0x91   :  { %v932_v52 = vld [vmem:[#allocation12 + $0x528] sm:$0xff] }
 0x131   :  { %v220_v54 = vpop.f32.mrf.mxu0 }
 0x132   :  { %v221_v55 = vadd.f32 %v2134_v53, %v220_v54  ;;  %v803_v53 = vld [vmem:[#allocation12 + $0x120] sm:$0xff] }
 0x133   :  { %v2160_v56 = vpop.f32.mrf.mxu0  ;;  %v931_v54 = vld [vmem:[#allocation12 + $0x520] sm:$0xff] }
 0x134   :  { %v2528_v57 = vmax.f32 %v221_v55, 0.0  ;;  %v800_v55 = vld [vmem:[#allocation12 + $0x108] sm:$0xff] }
 0x135   :  { %v928_v56 = vld [vmem:[#allocation12 + $0x508] sm:$0xff] }
 0x136   :  { %2136 = vmatmul.mubr.msk.f32.vlgmr.msra.gmra.mxu1 %vm331_vm2, %v2528_v57  ;;  %2137 = vmatmul.mubr.msk.f32.vlgmr.msra.gmra.mxu0 %vm331_vm2, %v2528_v57 }
 0x137   :  { %494 = vmatpush1.msra.mxu1 %v285_v58  ;;  %565 = vmatpush1.msra.mxu0 %v287_v59  ;;  %v927_v58 = vld [vmem:[#allocation12 + $0x500] sm:$0xff]  ;;  %v796_v59 = vld [vmem:[#allocation12 + $0xe8] sm:$0xff] }
 0x138   :  { %495 = vmatprep.subr.mxu1 %v278_v60  ;;  %566 = vmatprep.subr.mxu0 %v280_v61  ;;  %v924_v60 = vld [vmem:[#allocation12 + $0x4e8] sm:$0xff]  ;;  %v795_v61 = vld [vmem:[#allocation12 + $0xe0] sm:$0xff] }
 0x139   :  { %496 = vmatpush1.msra.mxu1 %v277_v62  ;;  %567 = vmatpush1.msra.mxu0 %v279_v63  ;;  %v923_v62 = vld [vmem:[#allocation12 + $0x4e0] sm:$0xff]  ;;  %v792_v63 = vld [vmem:[#allocation12 + $0xc8] sm:$0xff] }
 0x13a   :  { %497 = vmatprep.subr.mxu1 %v270_v0  ;;  %568 = vmatprep.subr.mxu0 %v272_v2  ;;  %v920_v0 = vld [vmem:[#allocation12 + $0x4c8] sm:$0xff]  ;;  %v791_v2 = vld [vmem:[#allocation12 + $0xc0] sm:$0xff] }
 0x13b   :  { %498 = vmatpush1.msra.mxu1 %v269_v3  ;;  %569 = vmatpush1.msra.mxu0 %v271_v4  ;;  %v919_v3 = vld [vmem:[#allocation12 + $0x4c0] sm:$0xff]  ;;  %v788_v4 = vld [vmem:[#allocation12 + $0xa8] sm:$0xff] }
 0x13c   :  { %499 = vmatprep.subr.mxu1 %v262_v5  ;;  %570 = vmatprep.subr.mxu0 %v264_v6  ;;  %v916_v5 = vld [vmem:[#allocation12 + $0x4a8] sm:$0xff]  ;;  %v787_v6 = vld [vmem:[#allocation12 + $0xa0] sm:$0xff] }
 0x13d   :  { %500 = vmatpush1.msra.mxu1 %v261_v7  ;;  %571 = vmatpush1.msra.mxu0 %v263_v8  ;;  %v915_v7 = vld [vmem:[#allocation12 + $0x4a0] sm:$0xff]  ;;  %v784_v8 = vld [vmem:[#allocation12 + $0x88] sm:$0xff] }
 0x13e   :  { %501 = vmatprep.subr.mxu1 %v254_v9  ;;  %572 = vmatprep.subr.mxu0 %v256_v10  ;;  %v912_v9 = vld [vmem:[#allocation12 + $0x488] sm:$0xff]  ;;  %v783_v10 = vld [vmem:[#allocation12 + $0x80] sm:$0xff] }
 0x13f   :  { %502 = vmatpush1.msra.mxu1 %v253_v11  ;;  %573 = vmatpush1.msra.mxu0 %v255_v12  ;;  %v911_v11 = vld [vmem:[#allocation12 + $0x480] sm:$0xff]  ;;  %v780_v12 = vld [vmem:[#allocation12 + $0x68] sm:$0xff] }
 0x140   :  { %503 = vmatprep.subr.mxu1 %v246_v13  ;;  %574 = vmatprep.subr.mxu0 %v248_v14  ;;  %v908_v13 = vld [vmem:[#allocation12 + $0x468] sm:$0xff]  ;;  %v779_v14 = vld [vmem:[#allocation12 + $0x60] sm:$0xff] }
 0x141   :  { %504 = vmatpush1.msra.mxu1 %v245_v15  ;;  %575 = vmatpush1.msra.mxu0 %v247_v16  ;;  %v907_v15 = vld [vmem:[#allocation12 + $0x460] sm:$0xff]  ;;  %v776_v16 = vld [vmem:[#allocation12 + $0x48] sm:$0xff] }
 0x142   :  { %505 = vmatprep.subr.mxu1 %v238_v17  ;;  %576 = vmatprep.subr.mxu0 %v240_v18  ;;  %v904_v17 = vld [vmem:[#allocation12 + $0x448] sm:$0xff]  ;;  %v775_v18 = vld [vmem:[#allocation12 + $0x40] sm:$0xff] }
 0x143   :  { %506 = vmatpush1.msra.mxu1 %v237_v19  ;;  %577 = vmatpush1.msra.mxu0 %v239_v20  ;;  %v903_v19 = vld [vmem:[#allocation12 + $0x440] sm:$0xff]  ;;  %v772_v20 = vld [vmem:[#allocation12 + $0x28] sm:$0xff] }
 0x144   :  { %507 = vmatprep.subr.mxu1 %v230_v21  ;;  %578 = vmatprep.subr.mxu0 %v232_v22  ;;  %v900_v21 = vld [vmem:[#allocation12 + $0x428] sm:$0xff]  ;;  %v771_v22 = vld [vmem:[#allocation12 + $0x20] sm:$0xff] }
 0x145   :  { %508 = vmatpush1.msra.mxu1 %v229_v23  ;;  %541 = vmatprep.mubr.f32.mxu1 %v2404_v1  ;;  %v899_v23 = vld [vmem:[#allocation12 + $0x420] sm:$0xff] }
 0x146   :  { %579 = vmatpush1.msra.mxu0 %v231_v24  ;;  %612 = vmatprep.mubr.f32.mxu0 %v2404_v1  ;;  %v819_v1 = vld [vmem:[#allocation12 + $0x1a0] sm:$0xff]  ;;  %v768_v24 = vld [vmem:[#allocation12 + $0x8] sm:$0xff] }
 0x147   :  { %2138 = vmatmul.mubr.msk.f32.vlgmr.msra.gmra.mxu1 %vm331_vm2, %v2528_v57  ;;  %2139 = vmatmul.mubr.msk.f32.vlgmr.msra.gmra.mxu0 %vm331_vm2, %v2528_v57  ;;  %v799_v57 = vld [vmem:[#allocation12 + $0x100] sm:$0xff] }
 0x148   :  { %1301 = vmatprep.subr.mxu1 %v828_v25  ;;  %1378 = vmatprep.subr.mxu0 %v956_v26  ;;  %v896_v25 = vld [vmem:[#allocation12 + $0x408] sm:$0xff]  ;;  %v767_v26 = vld [vmem:[#allocation12] sm:$0xff] }
 0x149   :  { %1302 = vmatpush1.msra.mxu1 %v827_v27  ;;  %1379 = vmatpush1.msra.mxu0 %v955_v28  ;;  %v895_v27 = vld [vmem:[#allocation12 + $0x400] sm:$0xff]  ;;  %v892_v28 = vld [vmem:[#allocation12 + $0x3e8] sm:$0xff] }
 0x14a   :  { %1303 = vmatprep.subr.mxu1 %v824_v29  ;;  %1380 = vmatprep.subr.mxu0 %v952_v30  ;;  %v1020_v29 = vld [vmem:[#allocation12 + $0x7e8] sm:$0xff]  ;;  %v891_v30 = vld [vmem:[#allocation12 + $0x3e0] sm:$0xff] }
 0x14b   :  { %1304 = vmatpush1.msra.mxu1 %v823_v31  ;;  %1381 = vmatpush1.msra.mxu0 %v951_v32  ;;  %v1019_v31 = vld [vmem:[#allocation12 + $0x7e0] sm:$0xff]  ;;  %v888_v32 = vld [vmem:[#allocation12 + $0x3c8] sm:$0xff] }
 0x14c   :  { %1305 = vmatprep.subr.mxu1 %v820_v33  ;;  %1382 = vmatprep.subr.mxu0 %v948_v34  ;;  %v1016_v33 = vld [vmem:[#allocation12 + $0x7c8] sm:$0xff]  ;;  %v887_v34 = vld [vmem:[#allocation12 + $0x3c0] sm:$0xff] }
 0x14d   :  { %1306 = vmatpush1.msra.mxu1 %v819_v1  ;;  %1383 = vmatpush1.msra.mxu0 %v947_v35  ;;  %v1015_v1 = vld [vmem:[#allocation12 + $0x7c0] sm:$0xff]  ;;  %v884_v35 = vld [vmem:[#allocation12 + $0x3a8] sm:$0xff] }
 0x14e   :  { %1307 = vmatprep.subr.mxu1 %v816_v36  ;;  %1384 = vmatprep.subr.mxu0 %v944_v37  ;;  %v1012_v36 = vld [vmem:[#allocation12 + $0x7a8] sm:$0xff]  ;;  %v883_v37 = vld [vmem:[#allocation12 + $0x3a0] sm:$0xff] }
 0x14f   :  { %1308 = vmatpush1.msra.mxu1 %v815_v38  ;;  %1385 = vmatpush1.msra.mxu0 %v943_v39  ;;  %v1011_v38 = vld [vmem:[#allocation12 + $0x7a0] sm:$0xff]  ;;  %v880_v39 = vld [vmem:[#allocation12 + $0x388] sm:$0xff] }
 0x150   :  { %1309 = vmatprep.subr.mxu1 %v812_v40  ;;  %1386 = vmatprep.subr.mxu0 %v940_v42  ;;  %v1008_v40 = vld [vmem:[#allocation12 + $0x788] sm:$0xff]  ;;  %v879_v42 = vld [vmem:[#allocation12 + $0x380] sm:$0xff] }
 0x151   :  { %1310 = vmatpush1.msra.mxu1 %v811_v43  ;;  %1387 = vmatpush1.msra.mxu0 %v939_v44  ;;  %v1007_v43 = vld [vmem:[#allocation12 + $0x780] sm:$0xff]  ;;  %v876_v44 = vld [vmem:[#allocation12 + $0x368] sm:$0xff] }
 0x152   :  { %1311 = vmatprep.subr.mxu1 %v808_v45  ;;  %1388 = vmatprep.subr.mxu0 %v936_v47  ;;  %v1004_v45 = vld [vmem:[#allocation12 + $0x768] sm:$0xff]  ;;  %v875_v47 = vld [vmem:[#allocation12 + $0x360] sm:$0xff] }
 0x153   :  { %1312 = vmatpush1.msra.mxu1 %v807_v49  ;;  %1389 = vmatpush1.msra.mxu0 %v935_v50  ;;  %v1003_v49 = vld [vmem:[#allocation12 + $0x760] sm:$0xff]  ;;  %v872_v50 = vld [vmem:[#allocation12 + $0x348] sm:$0xff] }
 0x154   :  { %1313 = vmatprep.subr.mxu1 %v804_v51  ;;  %1390 = vmatprep.subr.mxu0 %v932_v52  ;;  %v1000_v51 = vld [vmem:[#allocation12 + $0x748] sm:$0xff]  ;;  %v871_v52 = vld [vmem:[#allocation12 + $0x340] sm:$0xff] }
 0x155   :  { %1314 = vmatpush1.msra.mxu1 %v803_v53  ;;  %1391 = vmatpush1.msra.mxu0 %v931_v54  ;;  %v999_v53 = vld [vmem:[#allocation12 + $0x740] sm:$0xff]  ;;  %v868_v54 = vld [vmem:[#allocation12 + $0x328] sm:$0xff] }
 0x156   :  { %1315 = vmatprep.subr.mxu1 %v800_v55  ;;  %1392 = vmatprep.subr.mxu0 %v928_v56  ;;  %v996_v55 = vld [vmem:[#allocation12 + $0x728] sm:$0xff]  ;;  %v867_v56 = vld [vmem:[#allocation12 + $0x320] sm:$0xff] }
 0x157   :  { %1316 = vmatpush1.msra.mxu1 %v799_v57  ;;  %1393 = vmatpush1.msra.mxu0 %v927_v58  ;;  %v995_v57 = vld [vmem:[#allocation12 + $0x720] sm:$0xff]  ;;  %v864_v58 = vld [vmem:[#allocation12 + $0x308] sm:$0xff] }
 0x158   :  { %1317 = vmatprep.subr.mxu1 %v796_v59  ;;  %1394 = vmatprep.subr.mxu0 %v924_v60  ;;  %v992_v59 = vld [vmem:[#allocation12 + $0x708] sm:$0xff]  ;;  %v863_v60 = vld [vmem:[#allocation12 + $0x300] sm:$0xff] }
 0x159   :  { %1318 = vmatpush1.msra.mxu1 %v795_v61  ;;  %1395 = vmatpush1.msra.mxu0 %v923_v62  ;;  %v991_v61 = vld [vmem:[#allocation12 + $0x700] sm:$0xff]  ;;  %v860_v62 = vld [vmem:[#allocation12 + $0x2e8] sm:$0xff] }
 0x15a   :  { %1319 = vmatprep.subr.mxu1 %v792_v63  ;;  %1396 = vmatprep.subr.mxu0 %v920_v0  ;;  %v988_v63 = vld [vmem:[#allocation12 + $0x6e8] sm:$0xff]  ;;  %v859_v0 = vld [vmem:[#allocation12 + $0x2e0] sm:$0xff] }
 0x15b   :  { %1320 = vmatpush1.msra.mxu1 %v791_v2  ;;  %1397 = vmatpush1.msra.mxu0 %v919_v3  ;;  %v987_v2 = vld [vmem:[#allocation12 + $0x6e0] sm:$0xff]  ;;  %v856_v3 = vld [vmem:[#allocation12 + $0x2c8] sm:$0xff] }
 0x15c   :  { %1321 = vmatprep.subr.mxu1 %v788_v4  ;;  %1398 = vmatprep.subr.mxu0 %v916_v5  ;;  %v984_v4 = vld [vmem:[#allocation12 + $0x6c8] sm:$0xff]  ;;  %v855_v5 = vld [vmem:[#allocation12 + $0x2c0] sm:$0xff] }
 0x15d   :  { %1322 = vmatpush1.msra.mxu1 %v787_v6  ;;  %1399 = vmatpush1.msra.mxu0 %v915_v7  ;;  %v983_v6 = vld [vmem:[#allocation12 + $0x6c0] sm:$0xff]  ;;  %v852_v7 = vld [vmem:[#allocation12 + $0x2a8] sm:$0xff] }
 0x15e   :  { %1323 = vmatprep.subr.mxu1 %v784_v8  ;;  %1400 = vmatprep.subr.mxu0 %v912_v9  ;;  %v980_v8 = vld [vmem:[#allocation12 + $0x6a8] sm:$0xff]  ;;  %v851_v9 = vld [vmem:[#allocation12 + $0x2a0] sm:$0xff] }
 0x15f   :  { %1324 = vmatpush1.msra.mxu1 %v783_v10  ;;  %1401 = vmatpush1.msra.mxu0 %v911_v11  ;;  %v979_v10 = vld [vmem:[#allocation12 + $0x6a0] sm:$0xff]  ;;  %v848_v11 = vld [vmem:[#allocation12 + $0x288] sm:$0xff] }
 0x160   :  { %1325 = vmatprep.subr.mxu1 %v780_v12  ;;  %1402 = vmatprep.subr.mxu0 %v908_v13  ;;  %v976_v12 = vld [vmem:[#allocation12 + $0x688] sm:$0xff]  ;;  %v847_v13 = vld [vmem:[#allocation12 + $0x280] sm:$0xff] }
 0x161   :  { %1326 = vmatpush1.msra.mxu1 %v779_v14  ;;  %1403 = vmatpush1.msra.mxu0 %v907_v15  ;;  %v975_v14 = vld [vmem:[#allocation12 + $0x680] sm:$0xff]  ;;  %v844_v15 = vld [vmem:[#allocation12 + $0x268] sm:$0xff] }
 0x162   :  { %1327 = vmatprep.subr.mxu1 %v776_v16  ;;  %1404 = vmatprep.subr.mxu0 %v904_v17  ;;  %v972_v16 = vld [vmem:[#allocation12 + $0x668] sm:$0xff]  ;;  %v843_v17 = vld [vmem:[#allocation12 + $0x260] sm:$0xff] }
 0x163   :  { %1328 = vmatpush1.msra.mxu1 %v775_v18  ;;  %1405 = vmatpush1.msra.mxu0 %v903_v19  ;;  %v971_v18 = vld [vmem:[#allocation12 + $0x660] sm:$0xff]  ;;  %v840_v19 = vld [vmem:[#allocation12 + $0x248] sm:$0xff] }
 0x164   :  { %1329 = vmatprep.subr.mxu1 %v772_v20  ;;  %1406 = vmatprep.subr.mxu0 %v900_v21  ;;  %v968_v20 = vld [vmem:[#allocation12 + $0x648] sm:$0xff]  ;;  %v839_v21 = vld [vmem:[#allocation12 + $0x240] sm:$0xff] }
 0x165   :  { %1330 = vmatpush1.msra.mxu1 %v771_v22  ;;  %1407 = vmatpush1.msra.mxu0 %v899_v23  ;;  %v967_v22 = vld [vmem:[#allocation12 + $0x640] sm:$0xff]  ;;  %v836_v23 = vld [vmem:[#allocation12 + $0x228] sm:$0xff] }
 0x166   :  { %1331 = vmatprep.subr.mxu1 %v768_v24  ;;  %1408 = vmatprep.subr.mxu0 %v896_v25  ;;  %v964_v24 = vld [vmem:[#allocation12 + $0x628] sm:$0xff]  ;;  %v835_v25 = vld [vmem:[#allocation12 + $0x220] sm:$0xff] }
 0x167   :  { %1332 = vmatpush1.msra.mxu1 %v767_v26  ;;  %1409 = vmatpush1.msra.mxu0 %v895_v27  ;;  %v963_v26 = vld [vmem:[#allocation12 + $0x620] sm:$0xff]  ;;  %v832_v27 = vld [vmem:[#allocation12 + $0x208] sm:$0xff] }
 0x168   :  { %1333 = vmatprep.subr.mxu1 %v892_v28  ;;  %1410 = vmatprep.subr.mxu0 %v1020_v29  ;;  %v752_v28 = vld [vmem:[#allocation2 + $0x8] sm:$0xff] }
 0x169   :  { %1334 = vmatpush2.msra.mxu1 %v891_v30  ;;  %1411 = vmatpush2.msra.mxu0 %v1019_v31  ;;  %v831_v29 = vld [vmem:[#allocation12 + $0x200] sm:$0xff]  ;;  %v960_v30 = vld [vmem:[#allocation12 + $0x608] sm:$0xff]  ;;  %v751_v31 = vld [vmem:[#allocation2] sm:$0xff] }
 0x16a   :  { %1335 = vmatprep.subr.mxu1 %v888_v32  ;;  %1412 = vmatprep.subr.mxu0 %v1016_v33  ;;  %v959_v32 = vld [vmem:[#allocation12 + $0x600] sm:$0xff]  ;;  %v754_v33 = vld [vmem:[#allocation2 + $0x18] sm:$0xff] }
 0x16b   :  { %1336 = vmatpush2.msra.mxu1 %v887_v34  ;;  %1413 = vmatpush2.msra.mxu0 %v1015_v1  ;;  %v1084_v34 = vld [vmem:[#allocation12 + $0x9e8] sm:$0xff] }
 0x16c   :  { %1337 = vmatprep.subr.mxu1 %v884_v35  ;;  %1414 = vmatprep.subr.mxu0 %v1012_v36  ;;  %v1212_v1 = vld [vmem:[#allocation12 + $0xde8] sm:$0xff]  ;;  %v1083_v36 = vld [vmem:[#allocation12 + $0x9e0] sm:$0xff] }
 0x16d   :  { %1338 = vmatpush2.msra.mxu1 %v883_v37  ;;  %1415 = vmatpush2.msra.mxu0 %v1011_v38  ;;  %v753_v35 = vld [vmem:[#allocation2 + $0x10] sm:$0xff] }
 0x16e   :  { %1339 = vmatprep.subr.mxu1 %v880_v39  ;;  %1416 = vmatprep.subr.mxu0 %v1008_v40  ;;  %v1211_v37 = vld [vmem:[#allocation12 + $0xde0] sm:$0xff]  ;;  %v1080_v38 = vld [vmem:[#allocation12 + $0x9c8] sm:$0xff] }
 0x16f   :  { %1340 = vmatpush2.msra.mxu1 %v879_v42  ;;  %1417 = vmatpush2.msra.mxu0 %v1007_v43  ;;  %v1208_v39 = vld [vmem:[#allocation12 + $0xdc8] sm:$0xff]  ;;  %v690_v40 = vld [vmem:[%s2624_s0 + $0x8] sm:$0xff] }
 0x170   :  { %1341 = vmatprep.subr.mxu1 %v876_v44  ;;  %1418 = vmatprep.subr.mxu0 %v1004_v45  ;;  %v1079_v42 = vld [vmem:[#allocation12 + $0x9c0] sm:$0xff]  ;;  %2142 = vst.sshfl [vmem:[#allocation2 + $0x20] sm:$0x3 pattern:$0x76325410] %v690_v40  ;;  %v710_v44 = vcombine.high %v690_v40, %v690_v40  ;;  %v1076_v45 = vld [vmem:[#allocation12 + $0x9a8] sm:$0xff] }
 0x171   :  { %1342 = vmatpush2.msra.mxu1 %v875_v47  ;;  %1419 = vmatpush2.msra.mxu0 %v1003_v49  ;;  %v1207_v43 = vld [vmem:[#allocation12 + $0xdc0] sm:$0xff]  ;;  %v1204_v47 = vld [vmem:[#allocation12 + $0xda8] sm:$0xff] }
 0x172   :  { %1343 = vmatprep.subr.mxu1 %v872_v50  ;;  %1420 = vmatprep.subr.mxu0 %v1000_v51  ;;  %v1075_v49 = vld [vmem:[#allocation12 + $0x9a0] sm:$0xff]  ;;  %v717_v51 = vrot.slane %v690_v40, %v2524_v48  ;;  %2143 = vst.sshfl [vmem:[#allocation2 + $0x30] sm:$0x3 pattern:$0x76325410] %v710_v44  ;;  %v1152_v40 = vld [vmem:[#allocation12 + $0xc08] sm:$0xff] }
 0x173   :  { %1344 = vmatpush2.msra.mxu1 %v871_v52  ;;  %1421 = vmatpush2.msra.mxu0 %v999_v53  ;;  %v1203_v50 = vld [vmem:[#allocation12 + $0xda0] sm:$0xff]  ;;  %v724_v52 = vrot.slane %v710_v44, %v2524_v48  ;;  %v1072_v53 = vld [vmem:[#allocation12 + $0x988] sm:$0xff] }
 0x174   :  { %1345 = vmatprep.subr.mxu1 %v868_v54  ;;  %1422 = vmatprep.subr.mxu0 %v996_v55  ;;  %v1200_v54 = vld [vmem:[#allocation12 + $0xd88] sm:$0xff]  ;;  %v1071_v55 = vld [vmem:[#allocation12 + $0x980] sm:$0xff] }
 0x175   :  { %1346 = vmatpush2.msra.mxu1 %v867_v56  ;;  %1423 = vmatpush2.msra.mxu0 %v995_v57  ;;  %v1199_v56 = vld [vmem:[#allocation12 + $0xd80] sm:$0xff]  ;;  %v725_v57 = vcombine.high %v717_v51, %v717_v51  ;;  %v1148_v44 = vld [vmem:[#allocation12 + $0xbe8] sm:$0xff] }
 0x176   :  { %1347 = vmatprep.subr.mxu1 %v864_v58  ;;  %1424 = vmatprep.subr.mxu0 %v992_v59  ;;  %v726_v58 = vcombine.high %v724_v52, %v724_v52  ;;  %v1068_v59 = vld [vmem:[#allocation12 + $0x968] sm:$0xff]  ;;  %v1143_v52 = vld [vmem:[#allocation12 + $0xbc0] sm:$0xff] }
 0x177   :  { %1348 = vmatpush2.msra.mxu1 %v863_v60  ;;  %1425 = vmatpush2.msra.mxu0 %v991_v61  ;;  %v1196_v60 = vld [vmem:[#allocation12 + $0xd68] sm:$0xff]  ;;  %v1067_v61 = vld [vmem:[#allocation12 + $0x960] sm:$0xff]  ;;  %740 = vst [vmem:[#allocation2 + $0x28] sm:$0x3] %v725_v57 }
 0x178   :  { %1349 = vmatprep.subr.mxu1 %v860_v62  ;;  %1426 = vmatprep.subr.mxu0 %v988_v63  ;;  %v1195_v62 = vld [vmem:[#allocation12 + $0xd60] sm:$0xff]  ;;  %742 = vst [vmem:[#allocation2 + $0x38] sm:$0x3] %v726_v58  ;;  %v1064_v63 = vld [vmem:[#allocation12 + $0x948] sm:$0xff] }
 0x179   :  { %1350 = vmatpush2.msra.mxu1 %v859_v0  ;;  %1427 = vmatpush2.msra.mxu0 %v987_v2  ;;  %v1192_v0 = vld [vmem:[#allocation12 + $0xd48] sm:$0xff]  ;;  %v1063_v2 = vld [vmem:[#allocation12 + $0x940] sm:$0xff] }
 0x17a   :  { %1351 = vmatprep.subr.mxu1 %v856_v3  ;;  %1428 = vmatprep.subr.mxu0 %v984_v4  ;;  %v1191_v3 = vld [vmem:[#allocation12 + $0xd40] sm:$0xff]  ;;  %v1060_v4 = vld [vmem:[#allocation12 + $0x928] sm:$0xff] }
 0x17b   :  { %1352 = vmatpush2.msra.mxu1 %v855_v5  ;;  %1429 = vmatpush2.msra.mxu0 %v983_v6  ;;  %v1188_v5 = vld [vmem:[#allocation12 + $0xd28] sm:$0xff]  ;;  %v1059_v6 = vld [vmem:[#allocation12 + $0x920] sm:$0xff] }
 0x17c   :  { %1353 = vmatprep.subr.mxu1 %v852_v7  ;;  %1430 = vmatprep.subr.mxu0 %v980_v8  ;;  %v1187_v7 = vld [vmem:[#allocation12 + $0xd20] sm:$0xff]  ;;  %v1056_v8 = vld [vmem:[#allocation12 + $0x908] sm:$0xff] }
 0x17d   :  { %1354 = vmatpush2.msra.mxu1 %v851_v9  ;;  %1431 = vmatpush2.msra.mxu0 %v979_v10  ;;  %v1184_v9 = vld [vmem:[#allocation12 + $0xd08] sm:$0xff]  ;;  %v1055_v10 = vld [vmem:[#allocation12 + $0x900] sm:$0xff] }
 0x17e   :  { %1355 = vmatprep.subr.mxu1 %v848_v11  ;;  %1432 = vmatprep.subr.mxu0 %v976_v12  ;;  %v1183_v11 = vld [vmem:[#allocation12 + $0xd00] sm:$0xff]  ;;  %v1052_v12 = vld [vmem:[#allocation12 + $0x8e8] sm:$0xff] }
 0x17f   :  { %1356 = vmatpush2.msra.mxu1 %v847_v13  ;;  %1433 = vmatpush2.msra.mxu0 %v975_v14  ;;  %v1180_v13 = vld [vmem:[#allocation12 + $0xce8] sm:$0xff]  ;;  %v1051_v14 = vld [vmem:[#allocation12 + $0x8e0] sm:$0xff] }
 0x180   :  { %1357 = vmatprep.subr.mxu1 %v844_v15  ;;  %1434 = vmatprep.subr.mxu0 %v972_v16  ;;  %v1179_v15 = vld [vmem:[#allocation12 + $0xce0] sm:$0xff]  ;;  %v1048_v16 = vld [vmem:[#allocation12 + $0x8c8] sm:$0xff] }
 0x181   :  { %1358 = vmatpush2.msra.mxu1 %v843_v17  ;;  %1435 = vmatpush2.msra.mxu0 %v971_v18  ;;  %v1176_v17 = vld [vmem:[#allocation12 + $0xcc8] sm:$0xff]  ;;  %v1047_v18 = vld [vmem:[#allocation12 + $0x8c0] sm:$0xff] }
 0x182   :  { %1359 = vmatprep.subr.mxu1 %v840_v19  ;;  %1436 = vmatprep.subr.mxu0 %v968_v20  ;;  %v1175_v19 = vld [vmem:[#allocation12 + $0xcc0] sm:$0xff]  ;;  %v1044_v20 = vld [vmem:[#allocation12 + $0x8a8] sm:$0xff] }
 0x183   :  { %1360 = vmatpush2.msra.mxu1 %v839_v21  ;;  %1437 = vmatpush2.msra.mxu0 %v967_v22  ;;  %v1172_v21 = vld [vmem:[#allocation12 + $0xca8] sm:$0xff]  ;;  %v1043_v22 = vld [vmem:[#allocation12 + $0x8a0] sm:$0xff] }
 0x184   :  { %1361 = vmatprep.subr.mxu1 %v836_v23  ;;  %1438 = vmatprep.subr.mxu0 %v964_v24  ;;  %v1171_v23 = vld [vmem:[#allocation12 + $0xca0] sm:$0xff]  ;;  %v1040_v24 = vld [vmem:[#allocation12 + $0x888] sm:$0xff] }
 0x185   :  { %1362 = vmatpush2.msra.mxu1 %v835_v25  ;;  %1439 = vmatpush2.msra.mxu0 %v963_v26  ;;  %v1168_v25 = vld [vmem:[#allocation12 + $0xc88] sm:$0xff]  ;;  %v1039_v26 = vld [vmem:[#allocation12 + $0x880] sm:$0xff] }
 0x186   :  { %1363 = vmatprep.subr.mxu1 %v832_v27  ;;  %1365 = vmatprep.mubr.f32.mxu1 %v752_v28  ;;  %v1167_v27 = vld [vmem:[#allocation12 + $0xc80] sm:$0xff]  ;;  %v1036_v28 = vld [vmem:[#allocation12 + $0x868] sm:$0xff] }
 0x187   :  { %1364 = vmatpush2.msra.mxu1 %v831_v29  ;;  %1440 = vmatprep.subr.mxu0 %v960_v30  ;;  %v1164_v29 = vld [vmem:[#allocation12 + $0xc68] sm:$0xff]  ;;  %v1035_v30 = vld [vmem:[#allocation12 + $0x860] sm:$0xff] }
 0x188   :  { %1366 = vmatmul.mubr.f32.vlgmr.msra.gmra.mxu1 %v751_v31  ;;  %1441 = vmatpush2.msra.mxu0 %v959_v32  ;;  %v1163_v31 = vld [vmem:[#allocation12 + $0xc60] sm:$0xff]  ;;  %v1032_v32 = vld [vmem:[#allocation12 + $0x848] sm:$0xff] }
 0x189   :  { %1442 = vmatprep.mubr.f32.mxu0 %v754_v33  ;;  %1455 = vmatprep.subr.mxu1 %v1084_v34  ;;  %v1160_v33 = vld [vmem:[#allocation12 + $0xc48] sm:$0xff]  ;;  %v1031_v34 = vld [vmem:[#allocation12 + $0x840] sm:$0xff] }
 0x18a   :  { %1532 = vmatprep.subr.mxu0 %v1212_v1  ;;  %1443 = vmatmul.mubr.f32.vlgmr.msra.gmra.mxu0 %v753_v35  ;;  %v1159_v1 = vld [vmem:[#allocation12 + $0xc40] sm:$0xff]  ;;  %v1028_v35 = vld [vmem:[#allocation12 + $0x828] sm:$0xff] }
 0x18b   :  { %1456 = vmatpush1.msra.mxu1 %v1083_v36  ;;  %1533 = vmatpush1.msra.mxu0 %v1211_v37  ;;  %v1156_v36 = vld [vmem:[#allocation12 + $0xc28] sm:$0xff]  ;;  %v1027_v37 = vld [vmem:[#allocation12 + $0x820] sm:$0xff] }
 0x18c   :  { %1457 = vmatprep.subr.mxu1 %v1080_v38  ;;  %1534 = vmatprep.subr.mxu0 %v1208_v39  ;;  %v1155_v38 = vld [vmem:[#allocation12 + $0xc20] sm:$0xff]  ;;  %v1024_v39 = vld [vmem:[#allocation12 + $0x808] sm:$0xff] }
 0x18d   :  { %1458 = vmatpush1.msra.mxu1 %v1079_v42  ;;  %1535 = vmatpush1.msra.mxu0 %v1207_v43  ;;  %v1023_v42 = vld [vmem:[#allocation12 + $0x800] sm:$0xff]  ;;  %v1272_v51 = vld [vmem:[#allocation12 + $0xfc8] sm:$0xff] }
 0x18e   :  { %1459 = vmatprep.subr.mxu1 %v1076_v45  ;;  %1536 = vmatprep.subr.mxu0 %v1204_v47  ;;  %v1151_v43 = vld [vmem:[#allocation12 + $0xc00] sm:$0xff]  ;;  %v1276_v45 = vld [vmem:[#allocation12 + $0xfe8] sm:$0xff] }
 0x18f   :  { %1460 = vmatpush1.msra.mxu1 %v1075_v49  ;;  %1537 = vmatpush1.msra.mxu0 %v1203_v50  ;;  %v1147_v47 = vld [vmem:[#allocation12 + $0xbe0] sm:$0xff]  ;;  %v1144_v50 = vld [vmem:[#allocation12 + $0xbc8] sm:$0xff] }
 0x190   :  { %1461 = vmatprep.subr.mxu1 %v1072_v53  ;;  %1538 = vmatprep.subr.mxu0 %v1200_v54  ;;  %v1275_v49 = vld [vmem:[#allocation12 + $0xfe0] sm:$0xff]  ;;  %v1140_v54 = vld [vmem:[#allocation12 + $0xba8] sm:$0xff] }
 0x191   :  { %1462 = vmatpush1.msra.mxu1 %v1071_v55  ;;  %1539 = vmatpush1.msra.mxu0 %v1199_v56  ;;  %v1271_v53 = vld [vmem:[#allocation12 + $0xfc0] sm:$0xff]  ;;  %v1268_v55 = vld [vmem:[#allocation12 + $0xfa8] sm:$0xff] }
 0x192   :  { %1463 = vmatprep.subr.mxu1 %v1068_v59  ;;  %1540 = vmatprep.subr.mxu0 %v1196_v60  ;;  %v1139_v56 = vld [vmem:[#allocation12 + $0xba0] sm:$0xff]  ;;  %v1136_v58 = vld [vmem:[#allocation12 + $0xb88] sm:$0xff] }
 0x193   :  { %1464 = vmatpush1.msra.mxu1 %v1067_v61  ;;  %1541 = vmatpush1.msra.mxu0 %v1195_v62  ;;  %v1267_v57 = vld [vmem:[#allocation12 + $0xfa0] sm:$0xff]  ;;  %v1264_v59 = vld [vmem:[#allocation12 + $0xf88] sm:$0xff] }
 0x194   :  { %1465 = vmatprep.subr.mxu1 %v1064_v63  ;;  %1542 = vmatprep.subr.mxu0 %v1192_v0  ;;  %v1135_v60 = vld [vmem:[#allocation12 + $0xb80] sm:$0xff]  ;;  %v1132_v62 = vld [vmem:[#allocation12 + $0xb68] sm:$0xff] }
 0x195   :  { %1466 = vmatpush1.msra.mxu1 %v1063_v2  ;;  %1543 = vmatpush1.msra.mxu0 %v1191_v3  ;;  %v1263_v61 = vld [vmem:[#allocation12 + $0xf80] sm:$0xff]  ;;  %v1260_v63 = vld [vmem:[#allocation12 + $0xf68] sm:$0xff] }
 0x196   :  { %1467 = vmatprep.subr.mxu1 %v1060_v4  ;;  %1544 = vmatprep.subr.mxu0 %v1188_v5  ;;  %v1131_v0 = vld [vmem:[#allocation12 + $0xb60] sm:$0xff]  ;;  %v1128_v3 = vld [vmem:[#allocation12 + $0xb48] sm:$0xff] }
 0x197   :  { %1468 = vmatpush1.msra.mxu1 %v1059_v6  ;;  %1545 = vmatpush1.msra.mxu0 %v1187_v7  ;;  %v1259_v2 = vld [vmem:[#allocation12 + $0xf60] sm:$0xff]  ;;  %v1256_v4 = vld [vmem:[#allocation12 + $0xf48] sm:$0xff] }
 0x198   :  { %1469 = vmatprep.subr.mxu1 %v1056_v8  ;;  %1546 = vmatprep.subr.mxu0 %v1184_v9  ;;  %v1127_v5 = vld [vmem:[#allocation12 + $0xb40] sm:$0xff]  ;;  %v1124_v7 = vld [vmem:[#allocation12 + $0xb28] sm:$0xff] }
 0x199   :  { %1470 = vmatpush1.msra.mxu1 %v1055_v10  ;;  %1547 = vmatpush1.msra.mxu0 %v1183_v11  ;;  %v1255_v6 = vld [vmem:[#allocation12 + $0xf40] sm:$0xff]  ;;  %v1252_v8 = vld [vmem:[#allocation12 + $0xf28] sm:$0xff] }
 0x19a   :  { %1471 = vmatprep.subr.mxu1 %v1052_v12  ;;  %1548 = vmatprep.subr.mxu0 %v1180_v13  ;;  %v1123_v9 = vld [vmem:[#allocation12 + $0xb20] sm:$0xff]  ;;  %v1120_v11 = vld [vmem:[#allocation12 + $0xb08] sm:$0xff] }
 0x19b   :  { %1472 = vmatpush1.msra.mxu1 %v1051_v14  ;;  %1549 = vmatpush1.msra.mxu0 %v1179_v15  ;;  %v1251_v10 = vld [vmem:[#allocation12 + $0xf20] sm:$0xff]  ;;  %v1248_v12 = vld [vmem:[#allocation12 + $0xf08] sm:$0xff] }
 0x19c   :  { %1473 = vmatprep.subr.mxu1 %v1048_v16  ;;  %1550 = vmatprep.subr.mxu0 %v1176_v17  ;;  %v1119_v13 = vld [vmem:[#allocation12 + $0xb00] sm:$0xff]  ;;  %v1116_v15 = vld [vmem:[#allocation12 + $0xae8] sm:$0xff] }
 0x19d   :  { %1474 = vmatpush1.msra.mxu1 %v1047_v18  ;;  %1551 = vmatpush1.msra.mxu0 %v1175_v19  ;;  %v1247_v14 = vld [vmem:[#allocation12 + $0xf00] sm:$0xff]  ;;  %v1244_v16 = vld [vmem:[#allocation12 + $0xee8] sm:$0xff] }
 0x19e   :  { %1475 = vmatprep.subr.mxu1 %v1044_v20  ;;  %1552 = vmatprep.subr.mxu0 %v1172_v21  ;;  %v1115_v17 = vld [vmem:[#allocation12 + $0xae0] sm:$0xff]  ;;  %v1112_v19 = vld [vmem:[#allocation12 + $0xac8] sm:$0xff] }
 0x19f   :  { %1476 = vmatpush1.msra.mxu1 %v1043_v22  ;;  %1553 = vmatpush1.msra.mxu0 %v1171_v23  ;;  %v1243_v18 = vld [vmem:[#allocation12 + $0xee0] sm:$0xff]  ;;  %v1240_v20 = vld [vmem:[#allocation12 + $0xec8] sm:$0xff] }
 0x1a0   :  { %1477 = vmatprep.subr.mxu1 %v1040_v24  ;;  %1554 = vmatprep.subr.mxu0 %v1168_v25  ;;  %v1111_v21 = vld [vmem:[#allocation12 + $0xac0] sm:$0xff]  ;;  %v1108_v23 = vld [vmem:[#allocation12 + $0xaa8] sm:$0xff] }
 0x1a1   :  { %1478 = vmatpush1.msra.mxu1 %v1039_v26  ;;  %1555 = vmatpush1.msra.mxu0 %v1167_v27  ;;  %v1239_v22 = vld [vmem:[#allocation12 + $0xec0] sm:$0xff]  ;;  %v1236_v24 = vld [vmem:[#allocation12 + $0xea8] sm:$0xff] }
 0x1a2   :  { %1479 = vmatprep.subr.mxu1 %v1036_v28  ;;  %1556 = vmatprep.subr.mxu0 %v1164_v29  ;;  %v1107_v25 = vld [vmem:[#allocation12 + $0xaa0] sm:$0xff]  ;;  %v1104_v27 = vld [vmem:[#allocation12 + $0xa88] sm:$0xff] }
 0x1a3   :  { %1480 = vmatpush1.msra.mxu1 %v1035_v30  ;;  %1557 = vmatpush1.msra.mxu0 %v1163_v31  ;;  %v1235_v26 = vld [vmem:[#allocation12 + $0xea0] sm:$0xff]  ;;  %v1232_v28 = vld [vmem:[#allocation12 + $0xe88] sm:$0xff] }
 0x1a4   :  { %1481 = vmatprep.subr.mxu1 %v1032_v32  ;;  %1558 = vmatprep.subr.mxu0 %v1160_v33  ;;  %v1103_v29 = vld [vmem:[#allocation12 + $0xa80] sm:$0xff]  ;;  %v1100_v31 = vld [vmem:[#allocation12 + $0xa68] sm:$0xff] }
 0x1a5   :  { %1482 = vmatpush1.msra.mxu1 %v1031_v34  ;;  %1559 = vmatpush1.msra.mxu0 %v1159_v1  ;;  %v1231_v30 = vld [vmem:[#allocation12 + $0xe80] sm:$0xff]  ;;  %v1228_v32 = vld [vmem:[#allocation12 + $0xe68] sm:$0xff] }
 0x1a6   :  { %1483 = vmatprep.subr.mxu1 %v1028_v35  ;;  %1560 = vmatprep.subr.mxu0 %v1156_v36  ;;  %v1099_v33 = vld [vmem:[#allocation12 + $0xa60] sm:$0xff]  ;;  %v1096_v1 = vld [vmem:[#allocation12 + $0xa48] sm:$0xff] }
 0x1a7   :  { %1484 = vmatpush1.msra.mxu1 %v1027_v37  ;;  %1561 = vmatpush1.msra.mxu0 %v1155_v38  ;;  %v1227_v34 = vld [vmem:[#allocation12 + $0xe60] sm:$0xff]  ;;  %v1224_v35 = vld [vmem:[#allocation12 + $0xe48] sm:$0xff] }
 0x1a8   :  { %1485 = vmatprep.subr.mxu1 %v1024_v39  ;;  %1562 = vmatprep.subr.mxu0 %v1152_v40  ;;  %v1095_v36 = vld [vmem:[#allocation12 + $0xa40] sm:$0xff]  ;;  %v1092_v38 = vld [vmem:[#allocation12 + $0xa28] sm:$0xff] }
 0x1a9   :  { %1486 = vmatpush1.msra.mxu1 %v1023_v42  ;;  %1563 = vmatpush1.msra.mxu0 %v1151_v43  ;;  %v1223_v37 = vld [vmem:[#allocation12 + $0xe40] sm:$0xff]  ;;  %v1220_v39 = vld [vmem:[#allocation12 + $0xe28] sm:$0xff] }
 0x1aa   :  { %1487 = vmatprep.subr.mxu1 %v1148_v44  ;;  %1564 = vmatprep.subr.mxu0 %v1276_v45  ;;  %v1091_v40 = vld [vmem:[#allocation12 + $0xa20] sm:$0xff]  ;;  %v1088_v43 = vld [vmem:[#allocation12 + $0xa08] sm:$0xff] }
 0x1ab   :  { %1488 = vmatpush2.msra.mxu1 %v1147_v47  ;;  %1565 = vmatpush2.msra.mxu0 %v1275_v49  ;;  %v1219_v42 = vld [vmem:[#allocation12 + $0xe20] sm:$0xff]  ;;  %v1216_v44 = vld [vmem:[#allocation12 + $0xe08] sm:$0xff]  ;;  %v830_v49 = vld [vmem:[#allocation12 + $0x1f8] sm:$0xff] }
 0x1ac   :  { %1489 = vmatprep.subr.mxu1 %v1144_v50  ;;  %1566 = vmatprep.subr.mxu0 %v1272_v51  ;;  %v1087_v45 = vld [vmem:[#allocation12 + $0xa00] sm:$0xff]  ;;  %v958_v50 = vld [vmem:[#allocation12 + $0x5f8] sm:$0xff]  ;;  %v2546_v51 = vsub.s32 0, %v2521_v46 }
 0x1ad   :  { %1490 = vmatpush2.msra.mxu1 %v1143_v52  ;;  %1567 = vmatpush2.msra.mxu0 %v1271_v53  ;;  %v1215_v47 = vld [vmem:[#allocation12 + $0xe00] sm:$0xff]  ;;  %v2549_v52 = vsub.s32 2, %v2521_v46  ;;  %v289_v53 = vld [vmem:[#allocation11] sm:$0xff] }
 0x1ae   :  { %1491 = vmatprep.subr.mxu1 %v1140_v54  ;;  %1568 = vmatprep.subr.mxu0 %v1268_v55  ;;  %v2552_v54 = vsub.s32 1, %v2521_v46  ;;  %v2555_v55 = vsub.s32 3, %v2521_v46 }
 0x1af   :  { %1492 = vmatpush2.msra.mxu1 %v1139_v56  ;;  %1569 = vmatpush2.msra.mxu0 %v1267_v57  ;;  %v294_v56 = vrot.slane %v289_v53, %v2546_v51  ;;  %v302_v57 = vrot.slane %v289_v53, %v2549_v52 }
 0x1b0   :  { %1493 = vmatprep.subr.mxu1 %v1136_v58  ;;  %1570 = vmatprep.subr.mxu0 %v1264_v59  ;;  %v298_v58 = vrot.slane %v289_v53, %v2552_v54  ;;  %v306_v59 = vrot.slane %v289_v53, %v2555_v55 }
 0x1b1   :  { %1494 = vmatpush2.msra.mxu1 %v1135_v60  ;;  %1571 = vmatpush2.msra.mxu0 %v1263_v61 }
 0x1b2   :  { %1495 = vmatprep.subr.mxu1 %v1132_v62  ;;  %1572 = vmatprep.subr.mxu0 %v1260_v63 }
 0x1b3   :  { %1496 = vmatpush2.msra.mxu1 %v1131_v0  ;;  %1573 = vmatpush2.msra.mxu0 %v1259_v2 }
 0x1b4   :  { %1497 = vmatprep.subr.mxu1 %v1128_v3  ;;  %1574 = vmatprep.subr.mxu0 %v1256_v4 }
 0x1b5   :  { %1498 = vmatpush2.msra.mxu1 %v1127_v5  ;;  %1575 = vmatpush2.msra.mxu0 %v1255_v6  ;;  %v309_v5 = vsub.s32 4, %v2521_v46  ;;  %v317_v6 = vsub.s32 6, %v2521_v46 }
 0x1b6   :  { %1499 = vmatprep.subr.mxu1 %v1124_v7  ;;  %1576 = vmatprep.subr.mxu0 %v1252_v8  ;;  %v313_v7 = vsub.s32 5, %v2521_v46  ;;  %v321_v8 = vsub.s32 7, %v2521_v46 }
 0x1b7   :  { %1500 = vmatpush2.msra.mxu1 %v1123_v9  ;;  %1577 = vmatpush2.msra.mxu0 %v1251_v10  ;;  %v310_v9 = vrot.slane %v289_v53, %v309_v5  ;;  %v318_v10 = vrot.slane %v289_v53, %v317_v6  ;;  %v941_v6 = vld [vmem:[#allocation12 + $0x570] sm:$0xff] }
 0x1b8   :  { %1501 = vmatprep.subr.mxu1 %v1120_v11  ;;  %1578 = vmatprep.subr.mxu0 %v1248_v12  ;;  %v314_v12 = vrot.slane %v289_v53, %v313_v7  ;;  %v810_v7 = vld [vmem:[#allocation12 + $0x158] sm:$0xff] }
 0x1b9   :  { %1502 = vmatpush2.msra.mxu1 %v1119_v13  ;;  %1579 = vmatpush2.msra.mxu0 %v1247_v14  ;;  %v322_v13 = vrot.slane %v289_v53, %v321_v8  ;;  %v938_v8 = vld [vmem:[#allocation12 + $0x558] sm:$0xff] }
 0x1ba   :  { %1503 = vmatprep.subr.mxu1 %v1116_v15  ;;  %1580 = vmatprep.subr.mxu0 %v1244_v16 }
 0x1bb   :  { %1504 = vmatpush2.msra.mxu1 %v1115_v17  ;;  %1581 = vmatpush2.msra.mxu0 %v1243_v18 }
 0x1bc   :  { %1505 = vmatprep.subr.mxu1 %v1112_v19  ;;  %1582 = vmatprep.subr.mxu0 %v1240_v20 }
 0x1bd   :  { %1506 = vmatpush2.msra.mxu1 %v1111_v21  ;;  %1583 = vmatpush2.msra.mxu0 %v1239_v22 }
 0x1be   :  { %1507 = vmatprep.subr.mxu1 %v1108_v23  ;;  %1584 = vmatprep.subr.mxu0 %v1236_v24 }
 0x1bf   :  { %1508 = vmatpush2.msra.mxu1 %v1107_v25  ;;  %1585 = vmatpush2.msra.mxu0 %v1235_v26 }
 0x1c0   :  { %1509 = vmatprep.subr.mxu1 %v1104_v27  ;;  %1586 = vmatprep.subr.mxu0 %v1232_v28 }
 0x1c1   :  { %1510 = vmatpush2.msra.mxu1 %v1103_v29  ;;  %1587 = vmatpush2.msra.mxu0 %v1231_v30 }
 0x1c2   :  { %1511 = vmatprep.subr.mxu1 %v1100_v31  ;;  %1588 = vmatprep.subr.mxu0 %v1228_v32  ;;  %v756_v31 = vld [vmem:[#allocation2 + $0x28] sm:$0xff] }
 0x1c3   :  { %1512 = vmatpush2.msra.mxu1 %v1099_v33  ;;  %1589 = vmatpush2.msra.mxu0 %v1227_v34  ;;  %v758_v34 = vld [vmem:[#allocation2 + $0x38] sm:$0xff] }
 0x1c4   :  { %1513 = vmatprep.subr.mxu1 %v1096_v1  ;;  %1590 = vmatprep.subr.mxu0 %v1224_v35  ;;  %v755_v35 = vld [vmem:[#allocation2 + $0x20] sm:$0xff] }
 0x1c5   :  { %1514 = vmatpush2.msra.mxu1 %v1095_v36  ;;  %1591 = vmatpush2.msra.mxu0 %v1223_v37  ;;  %v757_v36 = vld [vmem:[#allocation2 + $0x30] sm:$0xff]  ;;  %v829_v37 = vld [vmem:[#allocation12 + $0x1f0] sm:$0xff] }
 0x1c6   :  { %1515 = vmatprep.subr.mxu1 %v1092_v38  ;;  %1592 = vmatprep.subr.mxu0 %v1220_v39  ;;  %v957_v38 = vld [vmem:[#allocation12 + $0x5f0] sm:$0xff]  ;;  %v826_v39 = vld [vmem:[#allocation12 + $0x1d8] sm:$0xff] }
 0x1c7   :  { %1516 = vmatpush2.msra.mxu1 %v1091_v40  ;;  %1593 = vmatpush2.msra.mxu0 %v1219_v42  ;;  %v954_v40 = vld [vmem:[#allocation12 + $0x5d8] sm:$0xff]  ;;  %v825_v42 = vld [vmem:[#allocation12 + $0x1d0] sm:$0xff] }
 0x1c8   :  { %1517 = vmatprep.subr.mxu1 %v1088_v43  ;;  %1594 = vmatprep.subr.mxu0 %v1216_v44  ;;  %v953_v44 = vld [vmem:[#allocation12 + $0x5d0] sm:$0xff] }
 0x1c9   :  { %1518 = vmatpush2.msra.mxu1 %v1087_v45  ;;  %1595 = vmatpush2.msra.mxu0 %v1215_v47  ;;  %v822_v45 = vld [vmem:[#allocation12 + $0x1b8] sm:$0xff] }
 0x1ca   :  { %1609 = vmatprep.subr.mxu1 %v830_v49  ;;  %1686 = vmatprep.subr.mxu0 %v958_v50  ;;  %v950_v49 = vld [vmem:[#allocation12 + $0x5b8] sm:$0xff]  ;;  %v821_v50 = vld [vmem:[#allocation12 + $0x1b0] sm:$0xff] }
 0x1f6   :  { %v401_v60 = vpop.f32.mrf.mxu1  ;;  %v472_v61 = vpop.f32.mrf.mxu0 }
 0x1f7   :  { %v402_v62 = vadd.f32 %v401_v60, %v294_v56  ;;  %v473_v63 = vadd.f32 %v472_v61, %v302_v57  ;;  %v949_v56 = vld [vmem:[#allocation12 + $0x5b0] sm:$0xff]  ;;  %v818_v57 = vld [vmem:[#allocation12 + $0x198] sm:$0xff] }
 0x1f8   :  { %v403_v0 = vpop.f32.mrf.mxu1  ;;  %v474_v2 = vpop.f32.mrf.mxu0  ;;  %v946_v60 = vld [vmem:[#allocation12 + $0x598] sm:$0xff]  ;;  %v817_v61 = vld [vmem:[#allocation12 + $0x190] sm:$0xff] }
 0x1f9   :  { %2184 = vtanh.f32 %v402_v62  ;;  %v404_v3 = vadd.f32 %v403_v0, %v298_v58  ;;  %v475_v4 = vadd.f32 %v474_v2, %v306_v59  ;;  %v814_v0 = vld [vmem:[#allocation12 + $0x178] sm:$0xff] }
 0x1fa   :  { %2186 = vtanh.f32 %v473_v63  ;;  %v945_v63 = vld [vmem:[#allocation12 + $0x590] sm:$0xff] }
 0x1fb   :  { %2188 = vtanh.f32 %v404_v3  ;;  %v942_v3 = vld [vmem:[#allocation12 + $0x578] sm:$0xff] }
 0x1fc   :  { %2190 = vtanh.f32 %v475_v4  ;;  %v813_v4 = vld [vmem:[#allocation12 + $0x170] sm:$0xff] }
 0x206   :  { %v2185_v11 = vpop.eup %2184 }
 0x207   :  { %v2187_v14 = vpop.eup %2186  ;;  %743 = vst [vmem:[#allocation2 + $0x40] sm:$0x3] %v2185_v11  ;;  %v543_v15 = vpop.f32.mrf.mxu1 }
 0x208   :  { %v614_v16 = vpop.f32.mrf.mxu0  ;;  %v2189_v17 = vpop.eup %2188  ;;  %745 = vst [vmem:[#allocation2 + $0x50] sm:$0x3] %v2187_v14  ;;  %v544_v18 = vadd.f32 %v543_v15, %v310_v9  ;;  %v809_v9 = vld [vmem:[#allocation12 + $0x150] sm:$0xff] }
 0x209   :  { %v615_v19 = vadd.f32 %v614_v16, %v318_v10  ;;  %v2191_v20 = vpop.eup %2190  ;;  %v635_v21 = vcombine.low %v2185_v11, %v2189_v17  ;;  %744 = vst [vmem:[#allocation2 + $0x48] sm:$0x3] %v2189_v17  ;;  %v545_v22 = vpop.f32.mrf.mxu1  ;;  %v937_v11 = vld [vmem:[#allocation12 + $0x550] sm:$0xff] }
 0x20a   :  { %v616_v23 = vpop.f32.mrf.mxu0  ;;  %v636_v24 = vcombine.low %v2187_v14, %v2191_v20  ;;  %746 = vst [vmem:[#allocation2 + $0x58] sm:$0x3] %v2191_v20  ;;  %2192 = vtanh.f32 %v544_v18  ;;  %v546_v25 = vadd.f32 %v545_v22, %v314_v12  ;;  %v806_v12 = vld [vmem:[#allocation12 + $0x138] sm:$0xff]  ;;  %v805_v16 = vld [vmem:[#allocation12 + $0x130] sm:$0xff] }
 0x20b   :  { %v617_v26 = vadd.f32 %v616_v23, %v322_v13  ;;  %v643_v27 = vrot.slane %v635_v21, %v2524_v48  ;;  %2194 = vtanh.f32 %v615_v19  ;;  %v934_v13 = vld [vmem:[#allocation12 + $0x538] sm:$0xff]  ;;  %v933_v18 = vld [vmem:[#allocation12 + $0x530] sm:$0xff] }
 0x20c   :  { %v650_v28 = vrot.slane %v636_v24, %v2524_v48  ;;  %2196 = vtanh.f32 %v546_v25  ;;  %v802_v19 = vld [vmem:[#allocation12 + $0x118] sm:$0xff]  ;;  %v801_v21 = vld [vmem:[#allocation12 + $0x110] sm:$0xff] }
 0x20d   :  { %2198 = vtanh.f32 %v617_v26  ;;  %v930_v20 = vld [vmem:[#allocation12 + $0x518] sm:$0xff]  ;;  %v929_v22 = vld [vmem:[#allocation12 + $0x510] sm:$0xff] }
 0x20e   :  { %v651_v29 = vcombine.low %v643_v27, %v650_v28  ;;  %v2575_v33 = vld [vmem:[#allocation2 + $0x40] sm:$0xff] }
 0x20f   :  { %v2579_v1 = vld [vmem:[#allocation2 + $0x50] sm:$0xff]  ;;  %v798_v23 = vld [vmem:[#allocation12 + $0xf8] sm:$0xff]  ;;  %v797_v25 = vld [vmem:[#allocation12 + $0xf0] sm:$0xff] }
 0x210   :  { %671 = vst [vmem:[%s2634_s10] sm:$0xff] %v651_v29  ;;  %v2570_v30 = vld [vmem:[#allocation2 + $0x48] sm:$0xff]  ;;  %v925_v26 = vld [vmem:[#allocation12 + $0x4f0] sm:$0xff] }
 0x211   :  { %1371 = vmatprep.mubr.f32.mxu1 %v2570_v30  ;;  %v2573_v32 = vld [vmem:[#allocation2 + $0x58] sm:$0xff]  ;;  %v926_v24 = vld [vmem:[#allocation12 + $0x4f8] sm:$0xff] }
 0x212   :  { %1448 = vmatprep.mubr.f32.mxu0 %v2573_v32  ;;  %1372 = vmatmul.mubr.f32.gmra.mxu1 %v2575_v33  ;;  %v794_v27 = vld [vmem:[#allocation12 + $0xd8] sm:$0xff]  ;;  %v793_v29 = vld [vmem:[#allocation12 + $0xd0] sm:$0xff] }
 0x213   :  { %1449 = vmatmul.mubr.f32.gmra.mxu0 %v2579_v1  ;;  %1519 = vmatprep.mubr.f32.mxu1 %v756_v31  ;;  %v922_v28 = vld [vmem:[#allocation12 + $0x4d8] sm:$0xff]  ;;  %v921_v31 = vld [vmem:[#allocation12 + $0x4d0] sm:$0xff] }
 0x214   :  { %1596 = vmatprep.mubr.f32.mxu0 %v758_v34  ;;  %v790_v34 = vld [vmem:[#allocation12 + $0xb8] sm:$0xff] }
 0x216   :  { %1520 = vmatmul.mubr.f32.vlgmr.msra.gmra.mxu1 %v755_v35  ;;  %v918_v35 = vld [vmem:[#allocation12 + $0x4b8] sm:$0xff] }
 0x217   :  { %v2193_v43 = vpop.eup %2192  ;;  %1597 = vmatmul.mubr.f32.vlgmr.msra.gmra.mxu0 %v757_v36  ;;  %1610 = vmatpush1.msra.mxu1 %v829_v37  ;;  %v789_v36 = vld [vmem:[#allocation12 + $0xb0] sm:$0xff] }
 0x218   :  { %v2195_v47 = vpop.eup %2194  ;;  %747 = vst [vmem:[#allocation2 + $0x60] sm:$0x3] %v2193_v43  ;;  %1687 = vmatpush1.msra.mxu0 %v957_v38  ;;  %1611 = vmatprep.subr.mxu1 %v826_v39  ;;  %v917_v37 = vld [vmem:[#allocation12 + $0x4b0] sm:$0xff]  ;;  %v786_v38 = vld [vmem:[#allocation12 + $0x98] sm:$0xff] }
 0x219   :  { %v2197_v53 = vpop.eup %2196  ;;  %749 = vst [vmem:[#allocation2 + $0x70] sm:$0x3] %v2195_v47  ;;  %1688 = vmatprep.subr.mxu0 %v954_v40  ;;  %1612 = vmatpush1.msra.mxu1 %v825_v42  ;;  %v914_v39 = vld [vmem:[#allocation12 + $0x498] sm:$0xff]  ;;  %v785_v40 = vld [vmem:[#allocation12 + $0x90] sm:$0xff] }
 0x21a   :  { %v2199_v58 = vpop.eup %2198  ;;  %v652_v59 = vcombine.low %v2193_v43, %v2197_v53  ;;  %748 = vst [vmem:[#allocation2 + $0x68] sm:$0x3] %v2197_v53  ;;  %1689 = vmatpush1.msra.mxu0 %v953_v44  ;;  %1613 = vmatprep.subr.mxu1 %v822_v45  ;;  %v913_v42 = vld [vmem:[#allocation12 + $0x490] sm:$0xff]  ;;  %v782_v43 = vld [vmem:[#allocation12 + $0x78] sm:$0xff] }
 0x21b   :  { %v653_v62 = vcombine.low %v2195_v47, %v2199_v58  ;;  %750 = vst [vmem:[#allocation2 + $0x78] sm:$0x3] %v2199_v58  ;;  %1690 = vmatprep.subr.mxu0 %v950_v49  ;;  %1614 = vmatpush1.msra.mxu1 %v821_v50  ;;  %v910_v44 = vld [vmem:[#allocation12 + $0x478] sm:$0xff]  ;;  %v781_v45 = vld [vmem:[#allocation12 + $0x70] sm:$0xff] }
 0x21c   :  { %v660_v2 = vrot.slane %v652_v59, %v2524_v48  ;;  %1691 = vmatpush1.msra.mxu0 %v949_v56  ;;  %1615 = vmatprep.subr.mxu1 %v818_v57  ;;  %v909_v47 = vld [vmem:[#allocation12 + $0x470] sm:$0xff]  ;;  %v778_v49 = vld [vmem:[#allocation12 + $0x58] sm:$0xff] }
 0x21d   :  { %v667_v5 = vrot.slane %v653_v62, %v2524_v48  ;;  %1692 = vmatprep.subr.mxu0 %v946_v60  ;;  %1616 = vmatpush1.msra.mxu1 %v817_v61  ;;  %v906_v50 = vld [vmem:[#allocation12 + $0x458] sm:$0xff]  ;;  %v777_v53 = vld [vmem:[#allocation12 + $0x50] sm:$0xff] }
 0x21e   :  { %1693 = vmatpush1.msra.mxu0 %v945_v63  ;;  %1617 = vmatprep.subr.mxu1 %v814_v0  ;;  %v905_v56 = vld [vmem:[#allocation12 + $0x450] sm:$0xff]  ;;  %v774_v57 = vld [vmem:[#allocation12 + $0x38] sm:$0xff] }
 0x21f   :  { %v668_v10 = vcombine.low %v660_v2, %v667_v5  ;;  %1694 = vmatprep.subr.mxu0 %v942_v3  ;;  %1618 = vmatpush1.msra.mxu1 %v813_v4  ;;  %v2592_v15 = vld [vmem:[#allocation2 + $0x60] sm:$0xff] }
 0x220   :  { %1695 = vmatpush1.msra.mxu0 %v941_v6  ;;  %1619 = vmatprep.subr.mxu1 %v810_v7  ;;  %v2596_v17 = vld [vmem:[#allocation2 + $0x70] sm:$0xff]  ;;  %v902_v58 = vld [vmem:[#allocation12 + $0x438] sm:$0xff]  ;;  %v773_v59 = vld [vmem:[#allocation12 + $0x30] sm:$0xff] }
 0x221   :  { %672 = vst [vmem:[%s2634_s10 + $0x8] sm:$0xff] %v668_v10  ;;  %1696 = vmatprep.subr.mxu0 %v938_v8  ;;  %v2587_v48 = vld [vmem:[#allocation2 + $0x68] sm:$0xff]  ;;  %1620 = vmatpush1.msra.mxu1 %v809_v9  ;;  %v901_v60 = vld [vmem:[#allocation12 + $0x430] sm:$0xff] }
 0x222   :  { %1525 = vmatprep.mubr.f32.mxu1 %v2587_v48  ;;  %v2590_v14 = vld [vmem:[#allocation2 + $0x78] sm:$0xff]  ;;  %1697 = vmatpush1.msra.mxu0 %v937_v11  ;;  %v770_v61 = vld [vmem:[#allocation12 + $0x18] sm:$0xff] }
 0x223   :  { %1602 = vmatprep.mubr.f32.mxu0 %v2590_v14  ;;  %1526 = vmatmul.mubr.f32.gmra.mxu1 %v2592_v15  ;;  %v898_v62 = vld [vmem:[#allocation12 + $0x418] sm:$0xff]  ;;  %v769_v63 = vld [vmem:[#allocation12 + $0x10] sm:$0xff] }
 0x224   :  { %1603 = vmatmul.mubr.f32.gmra.mxu0 %v2596_v17  ;;  %1621 = vmatprep.subr.mxu1 %v806_v12  ;;  %v897_v0 = vld [vmem:[#allocation12 + $0x410] sm:$0xff]  ;;  %v894_v2 = vld [vmem:[#allocation12 + $0x3f8] sm:$0xff] }
 0x225   :  { %1698 = vmatprep.subr.mxu0 %v934_v13  ;;  %1622 = vmatpush1.msra.mxu1 %v805_v16  ;;  %v1022_v3 = vld [vmem:[#allocation12 + $0x7f8] sm:$0xff]  ;;  %v893_v4 = vld [vmem:[#allocation12 + $0x3f0] sm:$0xff] }
 0x226   :  { %1699 = vmatpush1.msra.mxu0 %v933_v18  ;;  %1623 = vmatprep.subr.mxu1 %v802_v19  ;;  %v1021_v5 = vld [vmem:[#allocation12 + $0x7f0] sm:$0xff]  ;;  %v890_v6 = vld [vmem:[#allocation12 + $0x3d8] sm:$0xff] }
 0x227   :  { %1700 = vmatprep.subr.mxu0 %v930_v20  ;;  %1624 = vmatpush1.msra.mxu1 %v801_v21  ;;  %v1018_v7 = vld [vmem:[#allocation12 + $0x7d8] sm:$0xff]  ;;  %v889_v8 = vld [vmem:[#allocation12 + $0x3d0] sm:$0xff] }
 0x228   :  { %1701 = vmatpush1.msra.mxu0 %v929_v22  ;;  %1625 = vmatprep.subr.mxu1 %v798_v23  ;;  %v1017_v9 = vld [vmem:[#allocation12 + $0x7d0] sm:$0xff]  ;;  %v886_v10 = vld [vmem:[#allocation12 + $0x3b8] sm:$0xff] }
 0x229   :  { %1702 = vmatprep.subr.mxu0 %v926_v24  ;;  %1626 = vmatpush1.msra.mxu1 %v797_v25  ;;  %v1014_v11 = vld [vmem:[#allocation12 + $0x7b8] sm:$0xff]  ;;  %v885_v12 = vld [vmem:[#allocation12 + $0x3b0] sm:$0xff] }
 0x22a   :  { %1703 = vmatpush1.msra.mxu0 %v925_v26  ;;  %1627 = vmatprep.subr.mxu1 %v794_v27  ;;  %v1013_v13 = vld [vmem:[#allocation12 + $0x7b0] sm:$0xff]  ;;  %v882_v16 = vld [vmem:[#allocation12 + $0x398] sm:$0xff] }
 0x22b   :  { %1704 = vmatprep.subr.mxu0 %v922_v28  ;;  %1628 = vmatpush1.msra.mxu1 %v793_v29  ;;  %v1010_v18 = vld [vmem:[#allocation12 + $0x798] sm:$0xff]  ;;  %v881_v19 = vld [vmem:[#allocation12 + $0x390] sm:$0xff] }
 0x22c   :  { %1705 = vmatpush1.msra.mxu0 %v921_v31  ;;  %1629 = vmatprep.subr.mxu1 %v790_v34  ;;  %v1009_v20 = vld [vmem:[#allocation12 + $0x790] sm:$0xff]  ;;  %v878_v21 = vld [vmem:[#allocation12 + $0x378] sm:$0xff] }
 0x22d   :  { %1706 = vmatprep.subr.mxu0 %v918_v35  ;;  %1630 = vmatpush1.msra.mxu1 %v789_v36  ;;  %v1006_v22 = vld [vmem:[#allocation12 + $0x778] sm:$0xff]  ;;  %v877_v23 = vld [vmem:[#allocation12 + $0x370] sm:$0xff] }
 0x22e   :  { %1707 = vmatpush1.msra.mxu0 %v917_v37  ;;  %1631 = vmatprep.subr.mxu1 %v786_v38  ;;  %v1005_v24 = vld [vmem:[#allocation12 + $0x770] sm:$0xff]  ;;  %v874_v25 = vld [vmem:[#allocation12 + $0x358] sm:$0xff] }
 0x22f   :  { %1708 = vmatprep.subr.mxu0 %v914_v39  ;;  %1632 = vmatpush1.msra.mxu1 %v785_v40  ;;  %v1002_v26 = vld [vmem:[#allocation12 + $0x758] sm:$0xff]  ;;  %v873_v27 = vld [vmem:[#allocation12 + $0x350] sm:$0xff] }
 0x230   :  { %1709 = vmatpush1.msra.mxu0 %v913_v42  ;;  %1633 = vmatprep.subr.mxu1 %v782_v43  ;;  %v1001_v28 = vld [vmem:[#allocation12 + $0x750] sm:$0xff]  ;;  %v870_v29 = vld [vmem:[#allocation12 + $0x338] sm:$0xff] }
 0x231   :  { %1710 = vmatprep.subr.mxu0 %v910_v44  ;;  %1634 = vmatpush1.msra.mxu1 %v781_v45  ;;  %v998_v31 = vld [vmem:[#allocation12 + $0x738] sm:$0xff]  ;;  %v869_v34 = vld [vmem:[#allocation12 + $0x330] sm:$0xff] }
 0x232   :  { %1711 = vmatpush1.msra.mxu0 %v909_v47  ;;  %1635 = vmatprep.subr.mxu1 %v778_v49  ;;  %v997_v35 = vld [vmem:[#allocation12 + $0x730] sm:$0xff]  ;;  %v866_v36 = vld [vmem:[#allocation12 + $0x318] sm:$0xff] }
 0x233   :  { %1712 = vmatprep.subr.mxu0 %v906_v50  ;;  %1636 = vmatpush1.msra.mxu1 %v777_v53  ;;  %v994_v37 = vld [vmem:[#allocation12 + $0x718] sm:$0xff]  ;;  %v865_v38 = vld [vmem:[#allocation12 + $0x310] sm:$0xff] }
 0x234   :  { %1713 = vmatpush1.msra.mxu0 %v905_v56  ;;  %1637 = vmatprep.subr.mxu1 %v774_v57  ;;  %v993_v39 = vld [vmem:[#allocation12 + $0x710] sm:$0xff]  ;;  %v862_v40 = vld [vmem:[#allocation12 + $0x2f8] sm:$0xff] }
 0x235   :  { %1714 = vmatprep.subr.mxu0 %v902_v58  ;;  %1638 = vmatpush1.msra.mxu1 %v773_v59  ;;  %v990_v42 = vld [vmem:[#allocation12 + $0x6f8] sm:$0xff]  ;;  %v861_v43 = vld [vmem:[#allocation12 + $0x2f0] sm:$0xff] }
 0x236   :  { %1715 = vmatpush1.msra.mxu0 %v901_v60  ;;  %1639 = vmatprep.subr.mxu1 %v770_v61  ;;  %v989_v44 = vld [vmem:[#allocation12 + $0x6f0] sm:$0xff]  ;;  %v858_v45 = vld [vmem:[#allocation12 + $0x2d8] sm:$0xff] }
 0x237   :  { %1716 = vmatprep.subr.mxu0 %v898_v62  ;;  %1640 = vmatpush1.msra.mxu1 %v769_v63  ;;  %v986_v47 = vld [vmem:[#allocation12 + $0x6d8] sm:$0xff]  ;;  %v857_v49 = vld [vmem:[#allocation12 + $0x2d0] sm:$0xff] }
 0x238   :  { %1717 = vmatpush1.msra.mxu0 %v897_v0  ;;  %1641 = vmatprep.subr.mxu1 %v894_v2  ;;  %v985_v50 = vld [vmem:[#allocation12 + $0x6d0] sm:$0xff]  ;;  %v854_v53 = vld [vmem:[#allocation12 + $0x2b8] sm:$0xff] }
 0x239   :  { %1718 = vmatprep.subr.mxu0 %v1022_v3  ;;  %1642 = vmatpush2.msra.mxu1 %v893_v4  ;;  %v982_v56 = vld [vmem:[#allocation12 + $0x6b8] sm:$0xff]  ;;  %v853_v57 = vld [vmem:[#allocation12 + $0x2b0] sm:$0xff] }
 0x23a   :  { %1719 = vmatpush2.msra.mxu0 %v1021_v5  ;;  %1643 = vmatprep.subr.mxu1 %v890_v6  ;;  %v981_v58 = vld [vmem:[#allocation12 + $0x6b0] sm:$0xff]  ;;  %v850_v59 = vld [vmem:[#allocation12 + $0x298] sm:$0xff] }
 0x23b   :  { %1720 = vmatprep.subr.mxu0 %v1018_v7  ;;  %1644 = vmatpush2.msra.mxu1 %v889_v8  ;;  %v978_v60 = vld [vmem:[#allocation12 + $0x698] sm:$0xff]  ;;  %v849_v61 = vld [vmem:[#allocation12 + $0x290] sm:$0xff] }
 0x23c   :  { %1721 = vmatpush2.msra.mxu0 %v1017_v9  ;;  %1645 = vmatprep.subr.mxu1 %v886_v10  ;;  %v977_v62 = vld [vmem:[#allocation12 + $0x690] sm:$0xff]  ;;  %v846_v63 = vld [vmem:[#allocation12 + $0x278] sm:$0xff] }
 0x23d   :  { %1722 = vmatprep.subr.mxu0 %v1014_v11  ;;  %1646 = vmatpush2.msra.mxu1 %v885_v12  ;;  %v974_v0 = vld [vmem:[#allocation12 + $0x678] sm:$0xff]  ;;  %v845_v2 = vld [vmem:[#allocation12 + $0x270] sm:$0xff] }
 0x23e   :  { %1723 = vmatpush2.msra.mxu0 %v1013_v13  ;;  %1647 = vmatprep.subr.mxu1 %v882_v16  ;;  %v973_v3 = vld [vmem:[#allocation12 + $0x670] sm:$0xff]  ;;  %v842_v4 = vld [vmem:[#allocation12 + $0x258] sm:$0xff] }
 0x23f   :  { %1724 = vmatprep.subr.mxu0 %v1010_v18  ;;  %1648 = vmatpush2.msra.mxu1 %v881_v19  ;;  %v970_v5 = vld [vmem:[#allocation12 + $0x658] sm:$0xff]  ;;  %v841_v6 = vld [vmem:[#allocation12 + $0x250] sm:$0xff] }
 0x240   :  { %1725 = vmatpush2.msra.mxu0 %v1009_v20  ;;  %1649 = vmatprep.subr.mxu1 %v878_v21  ;;  %v969_v7 = vld [vmem:[#allocation12 + $0x650] sm:$0xff]  ;;  %v838_v8 = vld [vmem:[#allocation12 + $0x238] sm:$0xff] }
 0x241   :  { %1726 = vmatprep.subr.mxu0 %v1006_v22  ;;  %1650 = vmatpush2.msra.mxu1 %v877_v23  ;;  %v966_v9 = vld [vmem:[#allocation12 + $0x638] sm:$0xff]  ;;  %v837_v10 = vld [vmem:[#allocation12 + $0x230] sm:$0xff] }
 0x242   :  { %1727 = vmatpush2.msra.mxu0 %v1005_v24  ;;  %1651 = vmatprep.subr.mxu1 %v874_v25  ;;  %v965_v11 = vld [vmem:[#allocation12 + $0x630] sm:$0xff]  ;;  %v834_v12 = vld [vmem:[#allocation12 + $0x218] sm:$0xff]  ;;  %v2215_v25 = vld [vmem:[#allocation2 + $0x10] sm:$0xff] }
 0x243   :  { %1728 = vmatprep.subr.mxu0 %v1002_v26  ;;  %1652 = vmatpush2.msra.mxu1 %v873_v27  ;;  %v962_v13 = vld [vmem:[#allocation12 + $0x618] sm:$0xff]  ;;  %v833_v16 = vld [vmem:[#allocation12 + $0x210] sm:$0xff] }
 0x244   :  { %1729 = vmatpush2.msra.mxu0 %v1001_v28  ;;  %1653 = vmatprep.subr.mxu1 %v870_v29  ;;  %v961_v18 = vld [vmem:[#allocation12 + $0x610] sm:$0xff]  ;;  %v1086_v19 = vld [vmem:[#allocation12 + $0x9f8] sm:$0xff] }
 0x245   :  { %1730 = vmatprep.subr.mxu0 %v998_v31  ;;  %1654 = vmatpush2.msra.mxu1 %v869_v34  ;;  %v2212_v20 = vld [vmem:[#allocation2 + $0x8] sm:$0xff]  ;;  %v2213_v22 = vld [vmem:[#allocation2 + $0x18] sm:$0xff]  ;;  %v2214_v23 = vld [vmem:[#allocation2] sm:$0xff] }
 0x246   :  { %1731 = vmatpush2.msra.mxu0 %v997_v35  ;;  %1655 = vmatprep.subr.mxu1 %v866_v36  ;;  %v1214_v21 = vld [vmem:[#allocation12 + $0xdf8] sm:$0xff]  ;;  %v1085_v24 = vld [vmem:[#allocation12 + $0x9f0] sm:$0xff] }
 0x247   :  { %1732 = vmatprep.subr.mxu0 %v994_v37  ;;  %1656 = vmatpush2.msra.mxu1 %v865_v38  ;;  %v1213_v26 = vld [vmem:[#allocation12 + $0xdf0] sm:$0xff]  ;;  %v1082_v27 = vld [vmem:[#allocation12 + $0x9d8] sm:$0xff] }
 0x248   :  { %1733 = vmatpush2.msra.mxu0 %v993_v39  ;;  %1657 = vmatprep.subr.mxu1 %v862_v40  ;;  %v1210_v28 = vld [vmem:[#allocation12 + $0xdd8] sm:$0xff]  ;;  %v1081_v29 = vld [vmem:[#allocation12 + $0x9d0] sm:$0xff] }
 0x249   :  { %1734 = vmatprep.subr.mxu0 %v990_v42  ;;  %1658 = vmatpush2.msra.mxu1 %v861_v43  ;;  %v1209_v31 = vld [vmem:[#allocation12 + $0xdd0] sm:$0xff]  ;;  %v1078_v34 = vld [vmem:[#allocation12 + $0x9b8] sm:$0xff] }
 0x24a   :  { %1735 = vmatpush2.msra.mxu0 %v989_v44  ;;  %1659 = vmatprep.subr.mxu1 %v858_v45  ;;  %v1206_v35 = vld [vmem:[#allocation12 + $0xdb8] sm:$0xff]  ;;  %v1077_v36 = vld [vmem:[#allocation12 + $0x9b0] sm:$0xff] }
 0x24b   :  { %1736 = vmatprep.subr.mxu0 %v986_v47  ;;  %1660 = vmatpush2.msra.mxu1 %v857_v49  ;;  %v1205_v37 = vld [vmem:[#allocation12 + $0xdb0] sm:$0xff]  ;;  %v1074_v38 = vld [vmem:[#allocation12 + $0x998] sm:$0xff] }
 0x24c   :  { %1737 = vmatpush2.msra.mxu0 %v985_v50  ;;  %1661 = vmatprep.subr.mxu1 %v854_v53  ;;  %v1073_v39 = vld [vmem:[#allocation12 + $0x990] sm:$0xff]  ;;  %v1070_v40 = vld [vmem:[#allocation12 + $0x978] sm:$0xff] }
 0x24d   :  { %1738 = vmatprep.subr.mxu0 %v982_v56  ;;  %1662 = vmatpush2.msra.mxu1 %v853_v57  ;;  %v1198_v42 = vld [vmem:[#allocation12 + $0xd78] sm:$0xff]  ;;  %v1069_v43 = vld [vmem:[#allocation12 + $0x970] sm:$0xff] }
 0x24e   :  { %1739 = vmatpush2.msra.mxu0 %v981_v58  ;;  %1663 = vmatprep.subr.mxu1 %v850_v59  ;;  %v1197_v44 = vld [vmem:[#allocation12 + $0xd70] sm:$0xff]  ;;  %v1066_v45 = vld [vmem:[#allocation12 + $0x958] sm:$0xff] }
 0x24f   :  { %1740 = vmatprep.subr.mxu0 %v978_v60  ;;  %1664 = vmatpush2.msra.mxu1 %v849_v61  ;;  %v1065_v47 = vld [vmem:[#allocation12 + $0x950] sm:$0xff]  ;;  %v1062_v49 = vld [vmem:[#allocation12 + $0x938] sm:$0xff] }
 0x250   :  { %1741 = vmatpush2.msra.mxu0 %v977_v62  ;;  %1665 = vmatprep.subr.mxu1 %v846_v63  ;;  %v1190_v50 = vld [vmem:[#allocation12 + $0xd38] sm:$0xff]  ;;  %v1061_v53 = vld [vmem:[#allocation12 + $0x930] sm:$0xff] }
 0x251   :  { %1742 = vmatprep.subr.mxu0 %v974_v0  ;;  %1666 = vmatpush2.msra.mxu1 %v845_v2  ;;  %v1189_v56 = vld [vmem:[#allocation12 + $0xd30] sm:$0xff]  ;;  %v1058_v57 = vld [vmem:[#allocation12 + $0x918] sm:$0xff] }
 0x252   :  { %1743 = vmatpush2.msra.mxu0 %v973_v3  ;;  %1667 = vmatprep.subr.mxu1 %v842_v4  ;;  %v1186_v58 = vld [vmem:[#allocation12 + $0xd18] sm:$0xff]  ;;  %v1057_v59 = vld [vmem:[#allocation12 + $0x910] sm:$0xff] }
 0x253   :  { %1744 = vmatprep.subr.mxu0 %v970_v5  ;;  %1668 = vmatpush2.msra.mxu1 %v841_v6  ;;  %v1185_v60 = vld [vmem:[#allocation12 + $0xd10] sm:$0xff]  ;;  %v1054_v61 = vld [vmem:[#allocation12 + $0x8f8] sm:$0xff] }
 0x254   :  { %1745 = vmatpush2.msra.mxu0 %v969_v7  ;;  %1669 = vmatprep.subr.mxu1 %v838_v8  ;;  %v1182_v62 = vld [vmem:[#allocation12 + $0xcf8] sm:$0xff]  ;;  %v1053_v63 = vld [vmem:[#allocation12 + $0x8f0] sm:$0xff] }
 0x255   :  { %1746 = vmatprep.subr.mxu0 %v966_v9  ;;  %1670 = vmatpush2.msra.mxu1 %v837_v10  ;;  %v1181_v0 = vld [vmem:[#allocation12 + $0xcf0] sm:$0xff]  ;;  %v1050_v2 = vld [vmem:[#allocation12 + $0x8d8] sm:$0xff] }
 0x256   :  { %1747 = vmatpush2.msra.mxu0 %v965_v11  ;;  %1671 = vmatprep.subr.mxu1 %v834_v12  ;;  %v1178_v3 = vld [vmem:[#allocation12 + $0xcd8] sm:$0xff]  ;;  %v1049_v4 = vld [vmem:[#allocation12 + $0x8d0] sm:$0xff] }
 0x257   :  { %1748 = vmatprep.subr.mxu0 %v962_v13  ;;  %1672 = vmatpush2.msra.mxu1 %v833_v16  ;;  %v1177_v5 = vld [vmem:[#allocation12 + $0xcd0] sm:$0xff]  ;;  %v1046_v6 = vld [vmem:[#allocation12 + $0x8b8] sm:$0xff] }
 0x258   :  { %1673 = vmatprep.mubr.f32.mxu1 %v2212_v20  ;;  %1749 = vmatpush2.msra.mxu0 %v961_v18  ;;  %v1174_v7 = vld [vmem:[#allocation12 + $0xcb8] sm:$0xff]  ;;  %v1045_v8 = vld [vmem:[#allocation12 + $0x8b0] sm:$0xff] }
 0x259   :  { %1750 = vmatprep.mubr.f32.mxu0 %v2213_v22  ;;  %1674 = vmatmul.mubr.f32.vlgmr.msra.gmra.mxu1 %v2214_v23  ;;  %v1173_v9 = vld [vmem:[#allocation12 + $0xcb0] sm:$0xff]  ;;  %v1042_v10 = vld [vmem:[#allocation12 + $0x898] sm:$0xff] }
 0x25a   :  { %1751 = vmatmul.mubr.f32.vlgmr.msra.gmra.mxu0 %v2215_v25  ;;  %1763 = vmatprep.subr.mxu1 %v1086_v19  ;;  %v1170_v11 = vld [vmem:[#allocation12 + $0xc98] sm:$0xff]  ;;  %v1041_v12 = vld [vmem:[#allocation12 + $0x890] sm:$0xff] }
 0x25b   :  { %1840 = vmatprep.subr.mxu0 %v1214_v21  ;;  %1679 = vmatprep.mubr.f32.mxu1 %v2570_v30  ;;  %v1202_v30 = vld [vmem:[#allocation12 + $0xd98] sm:$0xff]  ;;  %v1169_v13 = vld [vmem:[#allocation12 + $0xc90] sm:$0xff] }
 0x25c   :  { %1756 = vmatprep.mubr.f32.mxu0 %v2573_v32  ;;  %1764 = vmatpush1.msra.mxu1 %v1085_v24  ;;  %v1201_v32 = vld [vmem:[#allocation12 + $0xd90] sm:$0xff]  ;;  %v1038_v16 = vld [vmem:[#allocation12 + $0x878] sm:$0xff] }
 0x25d   :  { %1841 = vmatpush1.msra.mxu0 %v1213_v26  ;;  %1765 = vmatprep.subr.mxu1 %v1082_v27  ;;  %v1166_v18 = vld [vmem:[#allocation12 + $0xc78] sm:$0xff]  ;;  %v1037_v19 = vld [vmem:[#allocation12 + $0x870] sm:$0xff] }
 0x25e   :  { %1842 = vmatprep.subr.mxu0 %v1210_v28  ;;  %1766 = vmatpush1.msra.mxu1 %v1081_v29  ;;  %v1165_v20 = vld [vmem:[#allocation12 + $0xc70] sm:$0xff]  ;;  %v1034_v21 = vld [vmem:[#allocation12 + $0x858] sm:$0xff] }
 0x25f   :  { %1843 = vmatpush1.msra.mxu0 %v1209_v31  ;;  %1680 = vmatmul.mubr.f32.gmra.mxu1 %v2575_v33  ;;  %v1194_v33 = vld [vmem:[#allocation12 + $0xd58] sm:$0xff]  ;;  %v1033_v23 = vld [vmem:[#allocation12 + $0x850] sm:$0xff] }
 0x260   :  { %1757 = vmatmul.mubr.f32.gmra.mxu0 %v2579_v1  ;;  %1767 = vmatprep.subr.mxu1 %v1078_v34  ;;  %v1193_v1 = vld [vmem:[#allocation12 + $0xd50] sm:$0xff]  ;;  %v1162_v22 = vld [vmem:[#allocation12 + $0xc58] sm:$0xff] }
 0x261   :  { %1844 = vmatprep.subr.mxu0 %v1206_v35  ;;  %1768 = vmatpush1.msra.mxu1 %v1077_v36  ;;  %v1161_v24 = vld [vmem:[#allocation12 + $0xc50] sm:$0xff]  ;;  %v1030_v25 = vld [vmem:[#allocation12 + $0x838] sm:$0xff] }
 0x262   :  { %1845 = vmatpush1.msra.mxu0 %v1205_v37  ;;  %1769 = vmatprep.subr.mxu1 %v1074_v38  ;;  %v1158_v26 = vld [vmem:[#allocation12 + $0xc38] sm:$0xff]  ;;  %v1029_v27 = vld [vmem:[#allocation12 + $0x830] sm:$0xff] }
 0x263   :  { %1846 = vmatprep.subr.mxu0 %v1202_v30  ;;  %1770 = vmatpush1.msra.mxu1 %v1073_v39  ;;  %v1157_v28 = vld [vmem:[#allocation12 + $0xc30] sm:$0xff]  ;;  %v1026_v29 = vld [vmem:[#allocation12 + $0x818] sm:$0xff] }
 0x264   :  { %1847 = vmatpush1.msra.mxu0 %v1201_v32  ;;  %1771 = vmatprep.subr.mxu1 %v1070_v40  ;;  %v1154_v31 = vld [vmem:[#allocation12 + $0xc18] sm:$0xff]  ;;  %v1025_v34 = vld [vmem:[#allocation12 + $0x810] sm:$0xff] }
 0x265   :  { %1848 = vmatprep.subr.mxu0 %v1198_v42  ;;  %1772 = vmatpush1.msra.mxu1 %v1069_v43  ;;  %v1153_v35 = vld [vmem:[#allocation12 + $0xc10] sm:$0xff]  ;;  %v1150_v36 = vld [vmem:[#allocation12 + $0xbf8] sm:$0xff] }
 0x266   :  { %1849 = vmatpush1.msra.mxu0 %v1197_v44  ;;  %1773 = vmatprep.subr.mxu1 %v1066_v45  ;;  %v1278_v37 = vld [vmem:[#allocation12 + $0xff8] sm:$0xff]  ;;  %v1149_v38 = vld [vmem:[#allocation12 + $0xbf0] sm:$0xff] }
 0x267   :  { %1850 = vmatprep.subr.mxu0 %v1194_v33  ;;  %1774 = vmatpush1.msra.mxu1 %v1065_v47  ;;  %v1277_v30 = vld [vmem:[#allocation12 + $0xff0] sm:$0xff]  ;;  %v1146_v39 = vld [vmem:[#allocation12 + $0xbd8] sm:$0xff] }
 0x268   :  { %1851 = vmatpush1.msra.mxu0 %v1193_v1  ;;  %1775 = vmatprep.subr.mxu1 %v1062_v49  ;;  %v1274_v32 = vld [vmem:[#allocation12 + $0xfd8] sm:$0xff]  ;;  %v1145_v40 = vld [vmem:[#allocation12 + $0xbd0] sm:$0xff] }
 0x269   :  { %1852 = vmatprep.subr.mxu0 %v1190_v50  ;;  %1776 = vmatpush1.msra.mxu1 %v1061_v53  ;;  %v1273_v42 = vld [vmem:[#allocation12 + $0xfd0] sm:$0xff]  ;;  %v1142_v43 = vld [vmem:[#allocation12 + $0xbb8] sm:$0xff] }
 0x26a   :  { %1853 = vmatpush1.msra.mxu0 %v1189_v56  ;;  %1777 = vmatprep.subr.mxu1 %v1058_v57  ;;  %v1270_v44 = vld [vmem:[#allocation12 + $0xfb8] sm:$0xff]  ;;  %v1141_v45 = vld [vmem:[#allocation12 + $0xbb0] sm:$0xff] }
 0x26b   :  { %1854 = vmatprep.subr.mxu0 %v1186_v58  ;;  %1778 = vmatpush1.msra.mxu1 %v1057_v59  ;;  %v1269_v33 = vld [vmem:[#allocation12 + $0xfb0] sm:$0xff]  ;;  %v1138_v47 = vld [vmem:[#allocation12 + $0xb98] sm:$0xff] }
 0x26c   :  { %1855 = vmatpush1.msra.mxu0 %v1185_v60  ;;  %1779 = vmatprep.subr.mxu1 %v1054_v61  ;;  %v1266_v1 = vld [vmem:[#allocation12 + $0xf98] sm:$0xff]  ;;  %v1137_v49 = vld [vmem:[#allocation12 + $0xb90] sm:$0xff] }
 0x26d   :  { %1856 = vmatprep.subr.mxu0 %v1182_v62  ;;  %1780 = vmatpush1.msra.mxu1 %v1053_v63  ;;  %v1265_v50 = vld [vmem:[#allocation12 + $0xf90] sm:$0xff]  ;;  %v1134_v53 = vld [vmem:[#allocation12 + $0xb78] sm:$0xff] }
 0x26e   :  { %1857 = vmatpush1.msra.mxu0 %v1181_v0  ;;  %1781 = vmatprep.subr.mxu1 %v1050_v2  ;;  %v1262_v56 = vld [vmem:[#allocation12 + $0xf78] sm:$0xff]  ;;  %v1133_v57 = vld [vmem:[#allocation12 + $0xb70] sm:$0xff] }
 0x26f   :  { %1858 = vmatprep.subr.mxu0 %v1178_v3  ;;  %1782 = vmatpush1.msra.mxu1 %v1049_v4  ;;  %v1261_v58 = vld [vmem:[#allocation12 + $0xf70] sm:$0xff]  ;;  %v1130_v59 = vld [vmem:[#allocation12 + $0xb58] sm:$0xff] }
 0x270   :  { %1859 = vmatpush1.msra.mxu0 %v1177_v5  ;;  %1783 = vmatprep.subr.mxu1 %v1046_v6  ;;  %v1258_v60 = vld [vmem:[#allocation12 + $0xf58] sm:$0xff]  ;;  %v1129_v61 = vld [vmem:[#allocation12 + $0xb50] sm:$0xff] }
 0x271   :  { %1860 = vmatprep.subr.mxu0 %v1174_v7  ;;  %1784 = vmatpush1.msra.mxu1 %v1045_v8  ;;  %v1257_v62 = vld [vmem:[#allocation12 + $0xf50] sm:$0xff]  ;;  %v1126_v63 = vld [vmem:[#allocation12 + $0xb38] sm:$0xff] }
 0x272   :  { %1861 = vmatpush1.msra.mxu0 %v1173_v9  ;;  %1785 = vmatprep.subr.mxu1 %v1042_v10  ;;  %v1254_v0 = vld [vmem:[#allocation12 + $0xf38] sm:$0xff]  ;;  %v1125_v2 = vld [vmem:[#allocation12 + $0xb30] sm:$0xff] }
 0x273   :  { %1862 = vmatprep.subr.mxu0 %v1170_v11  ;;  %1786 = vmatpush1.msra.mxu1 %v1041_v12  ;;  %v1253_v3 = vld [vmem:[#allocation12 + $0xf30] sm:$0xff]  ;;  %v1122_v4 = vld [vmem:[#allocation12 + $0xb18] sm:$0xff] }
 0x274   :  { %1863 = vmatpush1.msra.mxu0 %v1169_v13  ;;  %1787 = vmatprep.subr.mxu1 %v1038_v16  ;;  %v1250_v5 = vld [vmem:[#allocation12 + $0xf18] sm:$0xff]  ;;  %v1121_v6 = vld [vmem:[#allocation12 + $0xb10] sm:$0xff] }
 0x275   :  { %1864 = vmatprep.subr.mxu0 %v1166_v18  ;;  %1788 = vmatpush1.msra.mxu1 %v1037_v19  ;;  %v1249_v7 = vld [vmem:[#allocation12 + $0xf10] sm:$0xff]  ;;  %v1118_v8 = vld [vmem:[#allocation12 + $0xaf8] sm:$0xff] }
 0x276   :  { %1865 = vmatpush1.msra.mxu0 %v1165_v20  ;;  %1789 = vmatprep.subr.mxu1 %v1034_v21  ;;  %v1246_v9 = vld [vmem:[#allocation12 + $0xef8] sm:$0xff]  ;;  %v1117_v10 = vld [vmem:[#allocation12 + $0xaf0] sm:$0xff] }
 0x277   :  { %1866 = vmatprep.subr.mxu0 %v1162_v22  ;;  %1790 = vmatpush1.msra.mxu1 %v1033_v23  ;;  %v1245_v11 = vld [vmem:[#allocation12 + $0xef0] sm:$0xff]  ;;  %v1114_v12 = vld [vmem:[#allocation12 + $0xad8] sm:$0xff] }
 0x278   :  { %1867 = vmatpush1.msra.mxu0 %v1161_v24  ;;  %1791 = vmatprep.subr.mxu1 %v1030_v25  ;;  %v1242_v13 = vld [vmem:[#allocation12 + $0xed8] sm:$0xff]  ;;  %v1113_v16 = vld [vmem:[#allocation12 + $0xad0] sm:$0xff] }
 0x279   :  { %1868 = vmatprep.subr.mxu0 %v1158_v26  ;;  %1792 = vmatpush1.msra.mxu1 %v1029_v27  ;;  %v1241_v18 = vld [vmem:[#allocation12 + $0xed0] sm:$0xff]  ;;  %v1110_v19 = vld [vmem:[#allocation12 + $0xab8] sm:$0xff] }
 0x27a   :  { %1869 = vmatpush1.msra.mxu0 %v1157_v28  ;;  %1793 = vmatprep.subr.mxu1 %v1026_v29  ;;  %v1238_v20 = vld [vmem:[#allocation12 + $0xeb8] sm:$0xff]  ;;  %v1109_v21 = vld [vmem:[#allocation12 + $0xab0] sm:$0xff] }
 0x27b   :  { %1870 = vmatprep.subr.mxu0 %v1154_v31  ;;  %1794 = vmatpush1.msra.mxu1 %v1025_v34  ;;  %v1237_v22 = vld [vmem:[#allocation12 + $0xeb0] sm:$0xff]  ;;  %v1106_v23 = vld [vmem:[#allocation12 + $0xa98] sm:$0xff] }
 0x27c   :  { %1871 = vmatpush1.msra.mxu0 %v1153_v35  ;;  %1795 = vmatprep.subr.mxu1 %v1150_v36  ;;  %v1234_v24 = vld [vmem:[#allocation12 + $0xe98] sm:$0xff]  ;;  %v1105_v25 = vld [vmem:[#allocation12 + $0xa90] sm:$0xff] }
 0x27d   :  { %1872 = vmatprep.subr.mxu0 %v1278_v37  ;;  %1796 = vmatpush2.msra.mxu1 %v1149_v38  ;;  %v1233_v26 = vld [vmem:[#allocation12 + $0xe90] sm:$0xff]  ;;  %v1102_v27 = vld [vmem:[#allocation12 + $0xa78] sm:$0xff] }
 0x27e   :  { %1873 = vmatpush2.msra.mxu0 %v1277_v30  ;;  %1797 = vmatprep.subr.mxu1 %v1146_v39  ;;  %v1230_v28 = vld [vmem:[#allocation12 + $0xe78] sm:$0xff]  ;;  %v1101_v29 = vld [vmem:[#allocation12 + $0xa70] sm:$0xff] }
 0x27f   :  { %1874 = vmatprep.subr.mxu0 %v1274_v32  ;;  %1798 = vmatpush2.msra.mxu1 %v1145_v40  ;;  %v1229_v31 = vld [vmem:[#allocation12 + $0xe70] sm:$0xff]  ;;  %v1098_v34 = vld [vmem:[#allocation12 + $0xa58] sm:$0xff] }
 0x280   :  { %1875 = vmatpush2.msra.mxu0 %v1273_v42  ;;  %1799 = vmatprep.subr.mxu1 %v1142_v43  ;;  %v1226_v35 = vld [vmem:[#allocation12 + $0xe58] sm:$0xff]  ;;  %v1097_v36 = vld [vmem:[#allocation12 + $0xa50] sm:$0xff] }
 0x281   :  { %1876 = vmatprep.subr.mxu0 %v1270_v44  ;;  %1800 = vmatpush2.msra.mxu1 %v1141_v45  ;;  %v1225_v37 = vld [vmem:[#allocation12 + $0xe50] sm:$0xff]  ;;  %v1094_v38 = vld [vmem:[#allocation12 + $0xa38] sm:$0xff] }
 0x282   :  { %1877 = vmatpush2.msra.mxu0 %v1269_v33  ;;  %1801 = vmatprep.subr.mxu1 %v1138_v47  ;;  %v1222_v30 = vld [vmem:[#allocation12 + $0xe38] sm:$0xff]  ;;  %v1093_v39 = vld [vmem:[#allocation12 + $0xa30] sm:$0xff] }
 0x283   :  { %1878 = vmatprep.subr.mxu0 %v1266_v1  ;;  %1802 = vmatpush2.msra.mxu1 %v1137_v49  ;;  %v1221_v32 = vld [vmem:[#allocation12 + $0xe30] sm:$0xff]  ;;  %v1090_v40 = vld [vmem:[#allocation12 + $0xa18] sm:$0xff]  ;;  %v2219_v1 = vld [vmem:[#allocation2 + $0x30] sm:$0xff]  ;;  %v1367_v49 = vpop.f32.mrf.mxu1 }
 0x284   :  { %1879 = vmatpush2.msra.mxu0 %v1265_v50  ;;  %1803 = vmatprep.subr.mxu1 %v1134_v53  ;;  %v1218_v42 = vld [vmem:[#allocation12 + $0xe18] sm:$0xff]  ;;  %v1089_v43 = vld [vmem:[#allocation12 + $0xa10] sm:$0xff]  ;;  %v1444_v50 = vpop.f32.mrf.mxu0 }
 0x285   :  { %1880 = vmatprep.subr.mxu0 %v1262_v56  ;;  %1804 = vmatpush2.msra.mxu1 %v1133_v57  ;;  %v1217_v44 = vld [vmem:[#allocation12 + $0xe10] sm:$0xff]  ;;  %v2216_v45 = vld [vmem:[#allocation2 + $0x28] sm:$0xff]  ;;  %v1369_v53 = vpop.f32.mrf.mxu1 }
 0x286   :  { %1881 = vmatpush2.msra.mxu0 %v1261_v58  ;;  %1805 = vmatprep.subr.mxu1 %v1130_v59  ;;  %v2217_v33 = vld [vmem:[#allocation2 + $0x38] sm:$0xff]  ;;  %v2218_v47 = vld [vmem:[#allocation2 + $0x20] sm:$0xff]  ;;  %v1446_v56 = vpop.f32.mrf.mxu0 }
 0x287   :  { %1882 = vmatprep.subr.mxu0 %v1258_v60  ;;  %1806 = vmatpush2.msra.mxu1 %v1129_v61 }
 0x288   :  { %1883 = vmatpush2.msra.mxu0 %v1257_v62  ;;  %1807 = vmatprep.subr.mxu1 %v1126_v63  ;;  %v1279_v63 = vld [vmem:[#allocation14] sm:$0xf] }
 0x289   :  { %1884 = vmatprep.subr.mxu0 %v1254_v0  ;;  %1808 = vmatpush2.msra.mxu1 %v1125_v2 }
 0x28a   :  { %1885 = vmatpush2.msra.mxu0 %v1253_v3  ;;  %1809 = vmatprep.subr.mxu1 %v1122_v4 }
 0x28b   :  { %1886 = vmatprep.subr.mxu0 %v1250_v5  ;;  %1810 = vmatpush2.msra.mxu1 %v1121_v6 }
 0x28c   :  { %1887 = vmatpush2.msra.mxu0 %v1249_v7  ;;  %1811 = vmatprep.subr.mxu1 %v1118_v8 }
 0x28d   :  { %1888 = vmatprep.subr.mxu0 %v1246_v9  ;;  %1812 = vmatpush2.msra.mxu1 %v1117_v10 }
 0x28e   :  { %1889 = vmatpush2.msra.mxu0 %v1245_v11  ;;  %1813 = vmatprep.subr.mxu1 %v1114_v12 }
 0x28f   :  { %1890 = vmatprep.subr.mxu0 %v1242_v13  ;;  %1814 = vmatpush2.msra.mxu1 %v1113_v16 }
 0x290   :  { %1891 = vmatpush2.msra.mxu0 %v1241_v18  ;;  %1815 = vmatprep.subr.mxu1 %v1110_v19  ;;  %v1292_v19 = vrot.slane %v1279_v63, %v2549_v52 }
 0x291   :  { %1892 = vmatprep.subr.mxu0 %v1238_v20  ;;  %1816 = vmatpush2.msra.mxu1 %v1109_v21 }
 0x292   :  { %1893 = vmatpush2.msra.mxu0 %v1237_v22  ;;  %1817 = vmatprep.subr.mxu1 %v1106_v23 }
 0x293   :  { %1894 = vmatprep.subr.mxu0 %v1234_v24  ;;  %1818 = vmatpush2.msra.mxu1 %v1105_v25  ;;  %v1296_v24 = vrot.slane %v1279_v63, %v2555_v55 }
 0x294   :  { %1895 = vmatpush2.msra.mxu0 %v1233_v26  ;;  %1819 = vmatprep.subr.mxu1 %v1102_v27 }
 0x295   :  { %1896 = vmatprep.subr.mxu0 %v1230_v28  ;;  %1820 = vmatpush2.msra.mxu1 %v1101_v29 }
 0x296   :  { %1897 = vmatpush2.msra.mxu0 %v1229_v31  ;;  %1821 = vmatprep.subr.mxu1 %v1098_v34 }
 0x297   :  { %1898 = vmatprep.subr.mxu0 %v1226_v35  ;;  %1822 = vmatpush2.msra.mxu1 %v1097_v36 }
 0x298   :  { %1899 = vmatpush2.msra.mxu0 %v1225_v37  ;;  %1823 = vmatprep.subr.mxu1 %v1094_v38 }
 0x299   :  { %1900 = vmatprep.subr.mxu0 %v1222_v30  ;;  %1824 = vmatpush2.msra.mxu1 %v1093_v39 }
 0x29a   :  { %1901 = vmatpush2.msra.mxu0 %v1221_v32  ;;  %1825 = vmatprep.subr.mxu1 %v1090_v40 }
 0x29b   :  { %1902 = vmatprep.subr.mxu0 %v1218_v42  ;;  %1826 = vmatpush2.msra.mxu1 %v1089_v43 }
 0x29c   :  { %1827 = vmatprep.mubr.f32.mxu1 %v2216_v45  ;;  %1903 = vmatpush2.msra.mxu0 %v1217_v44  ;;  %v1941_v45 = vld [vmem:[#allocation15] sm:$0xf] }
 0x29d   :  { %1904 = vmatprep.mubr.f32.mxu0 %v2217_v33  ;;  %1828 = vmatmul.mubr.f32.vlgmr.msra.gmra.mxu1 %v2218_v47 }
 0x29e   :  { %1905 = vmatmul.mubr.f32.vlgmr.msra.gmra.mxu0 %v2219_v1  ;;  %1833 = vmatprep.mubr.f32.mxu1 %v2587_v48 }
 0x29f   :  { %1910 = vmatprep.mubr.f32.mxu0 %v2590_v14  ;;  %v1288_v14 = vrot.slane %v1279_v63, %v2552_v54 }
 0x2a1   :  { %1834 = vmatmul.mubr.f32.gmra.mxu1 %v2592_v15  ;;  %v1284_v15 = vrot.slane %v1279_v63, %v2546_v51  ;;  %v1370_v4 = vadd.f32 %v1369_v53, %v1288_v14  ;;  %v1950_v53 = vrot.slane %v1941_v45, %v2552_v54  ;;  %v1954_v54 = vrot.slane %v1941_v45, %v2549_v52 }
 0x2a2   :  { %1911 = vmatmul.mubr.f32.gmra.mxu0 %v2596_v17 }
 0x2a3   :  { %v1368_v7 = vadd.f32 %v1367_v49, %v1284_v15  ;;  %v1447_v10 = vadd.f32 %v1446_v56, %v1370_v4 }
 0x2a5   :  { %v1445_v13 = vadd.f32 %v1444_v50, %v1368_v7 }
 0x2d2   :  { %v1373_v57 = vpop.f32.mrf.mxu1 }
 0x2d3   :  { %v1450_v58 = vpop.f32.mrf.mxu0  ;;  %v1374_v11 = vadd.f32 %v1373_v57, %v1284_v15 }
 0x2d4   :  { %v1375_v59 = vpop.f32.mrf.mxu1 }
 0x2d5   :  { %v1452_v60 = vpop.f32.mrf.mxu0  ;;  %v1376_v8 = vadd.f32 %v1375_v59, %v1288_v14  ;;  %v1451_v21 = vadd.f32 %v1450_v58, %v1374_v11 }
 0x2d6   :  { %v1521_v61 = vpop.f32.mrf.mxu1 }
 0x2d7   :  { %v1598_v62 = vpop.f32.mrf.mxu0  ;;  %v1453_v16 = vadd.f32 %v1452_v60, %v1376_v8  ;;  %v1522_v22 = vadd.f32 %v1521_v61, %v1445_v13 }
 0x2d8   :  { %v1523_v0 = vpop.f32.mrf.mxu1 }
 0x2d9   :  { %v1600_v2 = vpop.f32.mrf.mxu0  ;;  %v1524_v18 = vadd.f32 %v1523_v0, %v1447_v10  ;;  %v1599_v31 = vadd.f32 %v1598_v62, %v1522_v22  ;;  %v1946_v62 = vrot.slane %v1941_v45, %v2546_v51 }
 0x2db   :  { %v1601_v26 = vadd.f32 %v1600_v2, %v1524_v18  ;;  %v1925_v40 = vmul.f32 0.2, %v1599_v31  ;;  %vm1917_vm4 = vcmp.gt.f32.partialorder %v1599_v31, 0.0 }
 0x2dd   :  { %v1926_v37 = vmul.f32 0.2, %v1601_v26  ;;  %vm1918_vm3 = vcmp.gt.f32.partialorder %v1601_v26, 0.0  ;;  %v1933_v61 = vsel %vm1917_vm4, %v1599_v31, %v1925_v40 }
 0x2df   :  { %v1934_v49 = vsel %vm1918_vm3, %v1601_v26, %v1926_v37 }
 0x2e3   :  { %v1527_v48 = vpop.f32.mrf.mxu1 }
 0x2e4   :  { %v1604_v3 = vpop.f32.mrf.mxu0  ;;  %v1528_v27 = vadd.f32 %v1527_v48, %v1451_v21 }
 0x2e5   :  { %v1529_v17 = vpop.f32.mrf.mxu1 }
 0x2e6   :  { %v1606_v5 = vpop.f32.mrf.mxu0  ;;  %v1530_v23 = vadd.f32 %v1529_v17, %v1453_v16  ;;  %v1605_v38 = vadd.f32 %v1604_v3, %v1528_v27 }
 0x2e8   :  { %v1607_v34 = vadd.f32 %v1606_v5, %v1530_v23  ;;  %v1929_v50 = vmul.f32 0.2, %v1605_v38  ;;  %vm1921_vm6 = vcmp.gt.f32.partialorder %v1605_v38, 0.0  ;;  %v1958_v5 = vrot.slane %v1941_v45, %v2555_v55 }
 0x2ea   :  { %v1930_v42 = vmul.f32 0.2, %v1607_v34  ;;  %vm1922_vm5 = vcmp.gt.f32.partialorder %v1607_v34, 0.0  ;;  %v1937_v17 = vsel %vm1921_vm6, %v1605_v38, %v1929_v50 }
 0x2ec   :  { %v1938_v63 = vsel %vm1922_vm5, %v1607_v34, %v1930_v42  ;;  %v2144_v34 = vld [vmem:[#allocation3] ss:$0 sm:$0xff] }
 0x2ed   :  { %v1968_v51 = vmul.f32 %v1950_v53, %v1938_v63 }
 0x319   :  { %v1675_v6 = vpop.f32.mrf.mxu1 }
 0x31a   :  { %v1752_v9 = vpop.f32.mrf.mxu0  ;;  %v1676_v28 = vadd.f32 %v1675_v6, %v1292_v19  ;;  %v1964_v6 = vmul.f32 %v1950_v53, %v1934_v49 }
 0x31b   :  { %v1677_v12 = vpop.f32.mrf.mxu1 }
 0x31c   :  { %v1754_v20 = vpop.f32.mrf.mxu0  ;;  %v1678_v35 = vadd.f32 %v1677_v12, %v1296_v24  ;;  %v1753_v30 = vadd.f32 %v1752_v9, %v1676_v28  ;;  %v1963_v12 = vmul.f32 %v1946_v62, %v1933_v61 }
 0x31e   :  { %v1755_v33 = vadd.f32 %v1754_v20, %v1678_v35  ;;  %v1971_v52 = vadd.f32 %v1964_v6, %v1963_v12 }
 0x31f   :  { %v1681_v25 = vpop.f32.mrf.mxu1 }
 0x320   :  { %v1758_v29 = vpop.f32.mrf.mxu0  ;;  %v1682_v39 = vadd.f32 %v1681_v25, %v1292_v19  ;;  %v1967_v19 = vmul.f32 %v1946_v62, %v1937_v17 }
 0x321   :  { %v1683_v36 = vpop.f32.mrf.mxu1 }
 0x322   :  { %v1760_v32 = vpop.f32.mrf.mxu0  ;;  %v1684_v43 = vadd.f32 %v1683_v36, %v1296_v24  ;;  %v1759_v57 = vadd.f32 %v1758_v29, %v1682_v39  ;;  %v1976_v25 = vadd.f32 %v1968_v51, %v1967_v19 }
 0x324   :  { %v1761_v0 = vadd.f32 %v1760_v32, %v1684_v43 }
 0x35d   :  { %v1829_v44 = vpop.f32.mrf.mxu1 }
 0x35e   :  { %v1830_v47 = vadd.f32 %v1829_v44, %v1753_v30  ;;  %v1906_v1 = vpop.f32.mrf.mxu0 }
 0x35f   :  { %v1831_v56 = vpop.f32.mrf.mxu1 }
 0x360   :  { %v1907_v58 = vadd.f32 %v1906_v1, %v1830_v47  ;;  %v1832_v59 = vadd.f32 %v1831_v56, %v1755_v33  ;;  %v1908_v60 = vpop.f32.mrf.mxu0 }
 0x361   :  { %v1835_v2 = vpop.f32.mrf.mxu1 }
 0x362   :  { %vm1919_vm7 = vcmp.gt.f32.partialorder %v1907_v58, 0.0  ;;  %v1927_v48 = vmul.f32 0.2, %v1907_v58  ;;  %v1909_v14 = vadd.f32 %v1908_v60, %v1832_v59  ;;  %v1836_v3 = vadd.f32 %v1835_v2, %v1759_v57  ;;  %v1912_v15 = vpop.f32.mrf.mxu0 }
 0x363   :  { %v1837_v4 = vpop.f32.mrf.mxu1  ;;  %v1992_v2 = vadd.s32 8, %v2521_v46 }
 0x364   :  { %vm1920_vm8 = vcmp.gt.f32.partialorder %v1909_v14, 0.0  ;;  %v1928_v7 = vmul.f32 0.2, %v1909_v14  ;;  %v1913_v8 = vadd.f32 %v1912_v15, %v1836_v3  ;;  %v1838_v9 = vadd.f32 %v1837_v4, %v1761_v0  ;;  %v1914_v10 = vpop.f32.mrf.mxu0 }
 0x365   :  { %v1935_v11 = vsel %vm1919_vm7, %v1907_v58, %v1927_v48  ;;  %vm1998_vm11 = vcmp.lt.s32.totalorder %v1992_v2, 10 }
 0x366   :  { %vm1923_vm9 = vcmp.gt.f32.partialorder %v1913_v8, 0.0  ;;  %v1931_v13 = vmul.f32 0.2, %v1913_v8  ;;  %v1915_v16 = vadd.f32 %v1914_v10, %v1838_v9  ;;  %v1936_v18 = vsel %vm1920_vm8, %v1909_v14, %v1928_v7 }
 0x367   :  { %v1965_v20 = vmul.f32 %v1954_v54, %v1935_v11  ;;  %v1966_v21 = vmul.f32 %v1958_v5, %v1936_v18 }
 0x368   :  { %v1939_v22 = vsel %vm1923_vm9, %v1913_v8, %v1931_v13  ;;  %vm1924_vm10 = vcmp.gt.f32.partialorder %v1915_v16, 0.0  ;;  %v1932_v55 = vmul.f32 0.2, %v1915_v16 }
 0x369   :  { %v1972_v23 = vadd.f32 %v1971_v52, %v1965_v20  ;;  %v1969_v24 = vmul.f32 %v1954_v54, %v1939_v22 }
 0x36a   :  { %v1940_v26 = vsel %vm1924_vm10, %v1915_v16, %v1932_v55 }
 0x36b   :  { %v1973_v27 = vadd.f32 %v1972_v23, %v1966_v21  ;;  %v1970_v28 = vmul.f32 %v1958_v5, %v1940_v26  ;;  %v1977_v29 = vadd.f32 %v1976_v25, %v1969_v24 }
 0x36d   :  { %1974 = vadd.xlane.f32.xlu0 %v1973_v27  ;;  %v1978_v31 = vadd.f32 %v1977_v29, %v1970_v28 }
 0x371   :  { %1979 = vadd.xlane.f32.xlu0 %v1978_v31 }
 0x3f6   :  { %v1975_v35 = vpop.xlane.xlu0 %1974 }
 0x3f7   :  { %v1988_v36 = vadd.f32 %v2144_v34, %v1975_v35 }
 0x3f9   :  { %v2001_v37 = vsub.f32 0.0, %v1988_v36 }
 0x3fa   :  { %v1980_v38 = vpop.xlane.xlu0 %1979 }
 0x3fb   :  { %v2005_v30 = vand.u32 2147483647, %v2001_v37  ;;  %v1989_v39 = vadd.f32 %v2144_v34, %v1980_v38  ;;  %v2003_v12 = vmax.f32 %v2001_v37, 0.0 }
 0x3fd   :  { %v2007_v32 = vsub.f32 0.0, %v2005_v30  ;;  %v2002_v40 = vsub.f32 0.0, %v1989_v39  ;;  %v2036_v42 = vand.u32 2147483647, %v1989_v39  ;;  %v2034_v8 = vmax.f32 %v1989_v39, 0.0 }
 0x3ff   :  { %v2009_v43 = vmul.f32 1.442695, %v2007_v32  ;;  %v2006_v44 = vand.u32 2147483647, %v2002_v40  ;;  %v2038_v45 = vsub.f32 0.0, %v2036_v42  ;;  %v2004_v16 = vmax.f32 %v2002_v40, 0.0 }
 0x401   :  { %2200 = vpow2.f32 %v2009_v43  ;;  %v2008_v33 = vsub.f32 0.0, %v2006_v44  ;;  %v2041_v47 = vmul.f32 1.442695, %v2038_v45 }
 0x403   :  { %v2011_v1 = vmul.f32 1.442695, %v2008_v33  ;;  %2202 = vpow2.f32 %v2041_v47 }
 0x405   :  { %2204 = vpow2.f32 %v2011_v1 }
 0x40e   :  { %v2201_v49 = vpop.eup %2200 }
 0x40f   :  { %v2013_v50 = vadd.f32 1.0, %v2201_v49  ;;  %v2016_v60 = vmul.f32 -0.5, %v2201_v49  ;;  %v2019_v14 = vand.u32 2147483647, %v2201_v49 }
 0x410   :  { %v2203_v53 = vpop.eup %2202 }
 0x411   :  { %v2052_v56 = vadd.f32 1.0, %v2203_v53  ;;  %2206 = vlog2.f32 %v2013_v50  ;;  %v2055_v59 = vmul.f32 -0.5, %v2203_v53  ;;  %v2017_v63 = vadd.f32 1.0, %v2016_v60 }
 0x412   :  { %v2205_v57 = vpop.eup %2204  ;;  %v2058_v48 = vand.u32 2147483647, %v2203_v53  ;;  %vm2020_vm13 = vcmp.lt.f32.partialorder %v2019_v14, 0.0004427343  ;;  %v2115_v50 = vand.u32 127, %v291_v41 }
 0x413   :  { %2208 = vlog2.f32 %v2052_v56  ;;  %v2022_v58 = vadd.f32 1.0, %v2205_v57  ;;  %v2025_v61 = vmul.f32 -0.5, %v2205_v57  ;;  %v2056_v62 = vadd.f32 1.0, %v2055_v59 }
 0x414   :  { %v2028_v4 = vand.u32 2147483647, %v2205_v57  ;;  %v2018_v6 = vmul.f32 %v2201_v49, %v2017_v63  ;;  %vm2059_vm12 = vcmp.lt.f32.partialorder %v2058_v48, 0.0004427343  ;;  %vm2117_vm1 = vcmp.eq.s32.totalorder %v2115_v50, 1 }
 0x415   :  { %2210 = vlog2.f32 %v2022_v58  ;;  %v2026_v3 = vadd.f32 1.0, %v2025_v61  ;;  %v2057_v5 = vmul.f32 %v2203_v53, %v2056_v62  ;;  %vm2116_vm2 = vcmp.eq.s32.totalorder %v2115_v50, 0 }
 0x416   :  { %vm2029_vm14 = vcmp.lt.f32.partialorder %v2028_v4, 0.0004427343 }
 0x417   :  { %v2027_v10 = vmul.f32 %v2205_v57, %v2026_v3 }
 0x41e   :  { %v2207_v0 = vpop.eup %2206 }
 0x41f   :  { %v2015_v15 = vmul.f32 0.6931472, %v2207_v0 }
 0x420   :  { %v2209_v17 = vpop.eup %2208 }
 0x421   :  { %v2054_v54 = vmul.f32 0.6931472, %v2209_v17  ;;  %v2021_v11 = vsel %vm2020_vm13, %v2018_v6, %v2015_v15 }
 0x422   :  { %v2211_v7 = vpop.eup %2210  ;;  %v2031_v21 = vadd.f32 %v2021_v11, %v2003_v12 }
 0x423   :  { %v2060_v9 = vsel %vm2059_vm12, %v2057_v5, %v2054_v54  ;;  %v2024_v51 = vmul.f32 0.6931472, %v2211_v7 }
 0x424   :  { %v2062_v13 = vadd.f32 %v2060_v9, %v2034_v8  ;;  %v2080_v23 = vsel %vm1993_vm0, %v2031_v21, 0.0 }
 0x425   :  { %v2030_v18 = vsel %vm2029_vm14, %v2027_v10, %v2024_v51  ;;  %v2082_v24 = vsel %vm2065_vm15, %v2080_v23, 0.0 }
 0x426   :  { %v2097_v19 = vsel %vm1998_vm11, %v2062_v13, 0.0  ;;  %v2032_v20 = vadd.f32 %v2030_v18, %v2004_v16 }
 0x427   :  { %v2099_v52 = vsel %vm2065_vm15, %v2097_v19, 0.0 }
 0x428   :  { %2101 = vadd.xlane.f32.xlu0 %v2099_v52  ;;  %v2064_v22 = vsel %vm1998_vm11, %v2032_v20, 0.0 }
 0x429   :  { %v2067_v55 = vsel %vm2065_vm15, %v2064_v22, 0.0 }
 0x42a   :  { %2069 = vadd.xlane.f32.xlu1 %v2067_v55 }
 0x42e   :  { %2085 = vadd.xlane.f32.xlu1 %v2082_v24 }
 0x4b1   :  { %v2102_v25 = vpop.xlane.xlu0 %2101 }
 0x4b2   :  { %v2103_v26 = vrot.slane %v2102_v25, 4 }
 0x4b3   :  { %v2070_v27 = vpop.xlane.xlu1 %2069 }
 0x4b4   :  { %v2104_v28 = vadd.f32 %v2103_v26, %v2102_v25  ;;  %v2071_v29 = vrot.slane %v2070_v27, 4 }
 0x4b6   :  { %v2072_v31 = vadd.f32 %v2071_v29, %v2070_v27  ;;  %v2105_v34 = vrot.slane %v2104_v28, 2 }
 0x4b7   :  { %v2086_v35 = vpop.xlane.xlu1 %2085 }
 0x4b8   :  { %v2073_v36 = vrot.slane %v2072_v31, 2  ;;  %v2087_v37 = vrot.slane %v2086_v35, 4  ;;  %v2106_v30 = vadd.f32 %v2105_v34, %v2104_v28 }
 0x4ba   :  { %v2088_v38 = vadd.f32 %v2087_v37, %v2086_v35  ;;  %v2074_v46 = vadd.f32 %v2073_v36, %v2072_v31  ;;  %v2107_v43 = vrot.slane %v2106_v30, 1 }
 0x4bc   :  { %v2089_v39 = vrot.slane %v2088_v38, 2  ;;  %v2075_v32 = vrot.slane %v2074_v46, 1  ;;  %v2108_v33 = vadd.f32 %v2107_v43, %v2106_v30 }
 0x4be   :  { %v2090_v40 = vadd.f32 %v2089_v39, %v2088_v38  ;;  %v2076_v42 = vadd.f32 %v2075_v32, %v2074_v46 }
 0x4c0   :  { %2161 = vpush %v2076_v42  ;;  %v2091_v44 = vrot.slane %v2090_v40, 1 }
 0x4c2   :  { %v2092_v45 = vadd.f32 %v2091_v44, %v2090_v40 }
 0x4c4   :  { %2163 = vpush %v2092_v45 }
 0x4c5   :  { %2165 = vpush %v2108_v33 }
 0x4f1   :  { %s2162_s10 = spop %2161 }
 0x4f2   :  { %v2078_v56 = vstv %s2162_s10 }
 0x4f3   :  { %v2079_v59 = vmul.f32 0.5, %v2078_v56 }
 0x4f5   :  { %s2164_s23 = spop %2163 }
 0x4f6   :  { %v2094_v47 = vstv %s2164_s23  ;;  %s2166_s24 = spop %2165 }
 0x4f7   :  { %v2095_v1 = vmul.f32 0.5, %v2094_v47  ;;  %v2110_v49 = vstv %s2166_s24 }
 0x4f8   :  { %v2111_v53 = vmul.f32 0.5, %v2110_v49 }
 0x4fa   :  { %v2112_v57 = vadd.f32 %v2111_v53, %v2095_v1 }
 0x4fc   :  { %v2113_v58 = vmul.f32 0.5, %v2112_v57 }
 0x4fe   :  { %v2118_v60 = vsel %vm2117_vm1, %v2113_v58, 0.0 }
 0x4ff   :  { %v2119_v61 = vsel %vm2116_vm2, %v2079_v59, %v2118_v60 }
 0x500   :  { %2120 = vst [vmem:[%s2635_s11] sm:$0x1] %v2119_v61 }
 0x501   :  { %2129 = vsyncpa [#allocation5], 1 }
 0x502   :  { %2130 = vsyncpa [#allocation7], 1 }
 0x503   :  { %2131 = vsyncpa [#allocation10], 1 }
 0x504   :  { %2132 = vsyncpa [#allocation13], 1 }
 0x505   :  { %2133 = vsyncpa [#allocation16], 1 }

</bundles_post_ra>
